<compile_context>
chip_gen: v5e
topology: v5e:2x2
jax: 0.10.0
libtpu: 0.0.40
codegen_flags: <defaults>
</compile_context>

<pallas_src>
import jax
import jax.numpy as jnp
from jax.experimental import pallas as pl
from jax.experimental.pallas import tpu as pltpu

_EPS = 1e-5  # torch LayerNorm default eps
_VMEM = pl.BlockSpec(memory_space=pltpu.MemorySpace.VMEM)


# ----------------------------- in-kernel helpers -----------------------------
def _layernorm(v, g, b):
    mu = jnp.mean(v, axis=-1, keepdims=True)
    var = jnp.mean((v - mu) ** 2, axis=-1, keepdims=True)
    return (v - mu) * jax.lax.rsqrt(var + _EPS) * g + b


def _gelu(v):
    # Exact (erf) GELU == torch.nn.GELU default.
    # TODO(synk): tanh-approx GELU would run on the otherwise-idle EUP, but changes numerics.
    return 0.5 * v * (1.0 + jax.lax.erf(v * 0.7071067811865476))


# ------------------------------- fused kernel -------------------------------
def _make_fused_kernel(n_layers, n_groups, d_hidden):
    assert n_groups >= 2 and d_hidden % n_groups == 0
    dg = d_hidden // n_groups

    def kernel(xf_ref, cat3_ref, adj_ref,                  # node feats (bf16), [cseq|bank|text] (bf16), mean-scaled adj (bf16)
               xw_ref, xb_ref, pwx_ref, pwc_ref, pb_ref,   # GSpadeNodeEmbedding projections
               pre_g_ref, pre_b_ref, grp_g_ref, grp_b_ref,
               wl_ref, wr_ref, bl_ref, post_g_ref, post_b_ref,  # GSpadeLayer stack (stacked params)
               o_ref):
        # ------------- GSpadeNodeEmbedding: x_proj -> (host concat) -> projection -------------
        x_p = (jnp.dot(xf_ref[...], xw_ref[...], preferred_element_type=jnp.float32)
               + xb_ref[...])
        x = (jnp.dot(x_p.astype(jnp.bfloat16), pwx_ref[...],
                     preferred_element_type=jnp.float32)
             + jnp.dot(cat3_ref[...], pwc_ref[...], preferred_element_type=jnp.float32)
             + pb_ref[...])

        # Mean-normalized undirected adjacency (pre-scaled by 1/deg on the host).
        adj = adj_ref[...]

        # ---------------- GSpadeLayer stack + final GELU ---------------------------------------
        # TODO(synk): convert to lax.fori_loop / a layer grid axis for deep production stacks.
        for l in range(n_layers):
            x_res = x
            # GSpadeLayer: act(pre_layer_norm(x))
            h = _gelu(_layernorm(x, pre_g_ref[l], pre_b_ref[l]))
            chunks = [h[:, g * dg:(g + 1) * dg] for g in range(n_groups)]

            # GroupAddRev: y = sum(chunks[1:]); for g: y = chunk[g] + RevGNNLayer_g(y)
            y = chunks[1]
            for g in range(2, n_groups):
                y = y + chunks[g]
            out_chunks = []
            for g in range(n_groups):
                lg = l * n_groups + g
                # RevGNNLayer: relu(LayerNorm(y)), then SAGEConv (mean aggr + root weight)
                z = jnp.maximum(_layernorm(y, grp_g_ref[lg], grp_b_ref[lg]), 0.0)
                z_bf = z.astype(jnp.bfloat16)
                agg = jnp.dot(adj, z_bf, preferred_element_type=jnp.float32)
                sage = (jnp.dot(agg.astype(jnp.bfloat16), wl_ref[lg],
                                preferred_element_type=jnp.float32)
                        + jnp.dot(z_bf, wr_ref[lg], preferred_element_type=jnp.float32)
                        + bl_ref[lg])
                y = chunks[g] + sage
                out_chunks.append(y)

            # GSpadeLayer: layer_norm(conv(x) + residual)  (one full-width concat per layer)
            conv_out = jnp.concatenate(out_chunks, axis=-1)
            x = _layernorm(conv_out + x_res, post_g_ref[l], post_b_ref[l])

        o_ref[...] = _gelu(x)

    return kernel


# ----------------------- plain-JAX glue (non-hot-path) ------------------------
def _bilstm_sum(seqs, lstm_params, hidden):
    # TODO(synk): LSTM recurrence kept in lax.scan (sequential dependency, tiny shapes).
    # seqs: (N, L, 8) -> (N, 2*hidden); matches bidirectional nn.LSTM(8, hidden) summed over time.
    def cell(p, carry, x_t):
        h, c = carry
        gates = x_t @ p['w_ih'].T + h @ p['w_hh'].T + p['b_ih'] + p['b_hh']
        i, f, g, o = jnp.split(gates, 4, axis=-1)
        c = jax.nn.sigmoid(f) * c + jax.nn.sigmoid(i) * jnp.tanh(g)
        h = jax.nn.sigmoid(o) * jnp.tanh(c)
        return (h, c), h

    def run(p, xs):  # xs: (L, N, 8)
        n = xs.shape[1]
        init = (jnp.zeros((n, hidden), jnp.float32), jnp.zeros((n, hidden), jnp.float32))
        _, hs = jax.lax.scan(lambda carry, x_t: cell(p, carry, x_t), init, xs)
        return hs

    xs = jnp.transpose(seqs, (1, 0, 2))
    h_fw = run(lstm_params['fw'], xs)
    h_bw = run(lstm_params['bw'], xs[::-1])[::-1]
    return jnp.concatenate([h_fw, h_bw], axis=-1).sum(axis=0)


def gspade_forward(params, x_feat, bank_ids, text_feats, seq_feats, seq_masks, rel):
    del seq_masks
    # TODO(synk): ragged per-node char sequences (boolean masking per unique mask id) have
    # no static-shape equivalent; we assume one fixed-length sequence per node laid out
    # contiguously (seq_masks == repeat(arange(N), L)).
    n = x_feat.shape[0]
    d = params['proj_w'].shape[1]
    n_layers = params['pre_g'].shape[0]
    n_groups = params['grp_g'].shape[0] // n_layers
    dg = d // n_groups

    # ----- char-LSTM node embeddings + embedding-table gathers (host / XLA) -----
    l = seq_feats.shape[0] // n
    cseq = _bilstm_sum(seq_feats.reshape(n, l, 8), params['lstm'], d // 2)
    bank_e = params['bank_emb'][bank_ids]
    txt_e = params['text_emb'][text_feats]
    cat3 = jnp.concatenate([cseq, bank_e, txt_e], axis=-1).astype(jnp.bfloat16)

    # ----- SpatialGraphBuilder4 folded to one (N, N) mean-normalized adjacency (host / XLA) -----
    # Dropout is eval-mode identity.  The 1x1 score conv + argmax fold into
    # w_diff = W[:,1]-W[:,0]; symmetrising the im2col patches == (score + score^T)/2
    # since the 3x3 conv is linear, so the logit map (and hence adj) is symmetric.
    cin = rel.shape[0]
    rel_hwc = jnp.transpose(rel, (1, 2, 0))                          # CHW -> HWC
    padded = jnp.pad(rel_hwc, ((1, 1), (1, 1), (0, 0)))
    taps = [padded[kh:kh + n, kw:kw + n, :] for kh in range(3) for kw in range(3)]
    patches = jnp.concatenate(taps, axis=-1)                         # (N, N, 9*Cin)
    psym = 0.5 * (patches + jnp.transpose(patches, (1, 0, 2)))
    w_diff = params['score_w'][:, 1] - params['score_w'][:, 0]       # (d_edge,)
    v = params['conv3_w'].reshape(9 * cin, -1) @ w_diff              # (9*Cin,)
    c_fold = (params['conv3_b'][0] @ w_diff
              + params['score_b'][0, 1] - params['score_b'][0, 0])
    logit_diff = jnp.einsum('ijc,c->ij', psym, v) + c_fold           # symmetric (N, N)
    # Strict '>' keeps torch.argmax's tie -> class 0 convention.
    adj = (logit_diff > 0.0).astype(jnp.float32)                     # adj == adj.T
    deg = jnp.sum(adj, axis=1, keepdims=True)
    # Pre-scale by 1/deg (SAGEConv mean aggregation) once; bf16 rounds 1/deg slightly.
    adj_scaled = (adj / jnp.maximum(deg, 1.0)).astype(jnp.bfloat16)
    # TODO(synk): edge_weights / per-edge edge_attr (torch.where + topk, dynamic E) are not
    # materialized: the edge_limit top-k branch is dead (edge_limit = 4N >= 2 ==
    # edge_index.shape[0]) and edge_attr / edge_weights never affect the returned x.

    # ----- weight layout prep: split projection / SAGE weights, bf16 matmul operands -----
    pw = params['proj_w']
    pwx = pw[:d].astype(jnp.bfloat16)                                # acts on x_proj output
    pwc = pw[d:].astype(jnp.bfloat16)                                # acts on [cseq|bank|text]
    wl = params['wlr'][:, :dg].astype(jnp.bfloat16)                  # SAGEConv lin_l (aggregated)
    wr = params['wlr'][:, dg:].astype(jnp.bfloat16)                  # SAGEConv lin_r (root)

    kernel = _make_fused_kernel(n_layers, n_groups, d)
    return pl.pallas_call(
        kernel,
        out_shape=jax.ShapeDtypeStruct((n, d), jnp.float32),
        in_specs=[_VMEM] * 17,
        out_specs=_VMEM,
        compiler_params=pltpu.CompilerParams(vmem_limit_bytes=32 * 1024 * 1024),
    )(x_feat.astype(jnp.bfloat16), cat3, adj_scaled,
      params['xproj_w'].astype(jnp.bfloat16), params['xproj_b'], pwx, pwc, params['proj_b'],
      params['pre_g'], params['pre_b'], params['grp_g'], params['grp_b'],
      wl, wr, params['bl'], params['post_g'], params['post_b'])


# -------------------------------- parameters --------------------------------
def init_params(key, d_x, d_hidden, d_edge, n_groups, n_layers, n_banks, cin=20):
    keys = iter(jax.random.split(key, 64))

    def nrm(shape, scale=0.1):
        return (scale * jax.random.normal(next(keys), shape)).astype(jnp.float32)

    h = d_hidden // 2
    dg = d_hidden // n_groups
    lg = n_layers * n_groups
    return {
        'lstm': {
            'fw': dict(w_ih=nrm((4 * h, 8)), w_hh=nrm((4 * h, h)),
                       b_ih=nrm((4 * h,)), b_hh=nrm((4 * h,))),
            'bw': dict(w_ih=nrm((4 * h, 8)), w_hh=nrm((4 * h, h)),
                       b_ih=nrm((4 * h,)), b_hh=nrm((4 * h,))),
        },
        'xproj_w': nrm((d_x, d_hidden)), 'xproj_b': nrm((1, d_hidden)),
        'bank_emb': nrm((n_banks + 1, d_hidden)),
        'text_emb': nrm((2, d_hidden)),
        'proj_w': nrm((4 * d_hidden, d_hidden)), 'proj_b': nrm((1, d_hidden)),
        # 3x3 conv (score_0 | score_1 fused on the out-channel dim), per-tap layout
        # (t = kh*3 + kw, Cin, Cout) == torch weight[o, c, kh, kw] transposed.
        'conv3_w': nrm((9, cin, d_edge)), 'conv3_b': nrm((1, d_edge)),
        # 1x1 "score" conv: (Cin=d_edge, Cout=2).
        'score_w': nrm((d_edge, 2)), 'score_b': nrm((1, 2)),
        # GSpadeLayer stack: params stacked over layers (and layer*group where per-group).
        'pre_g': jnp.ones((n_layers, 1, d_hidden), jnp.float32),
        'pre_b': jnp.zeros((n_layers, 1, d_hidden), jnp.float32),
        'grp_g': jnp.ones((lg, 1, dg), jnp.float32),
        'grp_b': jnp.zeros((lg, 1, dg), jnp.float32),
        # SAGEConv lin_l | lin_r stacked along K: rows [0:dg] act on the mean-aggregated
        # neighbours (lin_l, with bias bl), rows [dg:2*dg] on the root features (lin_r).
        'wlr': nrm((lg, 2 * dg, dg)),
        'bl': nrm((lg, 1, dg)),
        'post_g': jnp.ones((n_layers, 1, d_hidden), jnp.float32),
        'post_b': jnp.zeros((n_layers, 1, d_hidden), jnp.float32),
    }


# ----------------------------------- main -----------------------------------
if __name__ == "__main__":
    N, L, D_X = 16, 6, 24
    D_HIDDEN, D_EDGE, N_GROUPS, N_LAYERS, N_BANKS = 32, 8, 2, 2, 8

    root = jax.random.PRNGKey(0)
    kx, kb, kt, ks, kr, kp = jax.random.split(root, 6)

    x_feat = jax.random.normal(kx, (N, D_X), jnp.float32)           # batch.x
    bank_ids = jax.random.randint(kb, (N,), 0, N_BANKS + 1)         # batch.bank_ids
    text_feats = jax.random.randint(kt, (N,), 0, 2)                 # batch.text_features_v2
    seq_feats = jax.random.normal(ks, (N * L, 8), jnp.float32)      # batch.sequence_features
    seq_masks = jnp.repeat(jnp.arange(N, dtype=jnp.int32), L)       # batch.sequence_masks
    rel = jax.random.normal(kr, (20, N, N), jnp.float32)            # batch.relative_features

    params = init_params(kp, D_X, D_HIDDEN, D_EDGE, N_GROUPS, N_LAYERS, N_BANKS)

    fwd = jax.jit(gspade_forward)
    out = fwd(params, x_feat, bank_ids, text_feats, seq_feats, seq_masks, rel)
    jax.block_until_ready(out)
    assert out.shape == (N, D_HIDDEN) and out.dtype == jnp.float32
    print("KERNEL_OK")
</pallas_src>

<mosaic_0001>
module attributes {stable_mosaic.version = 11 : i64} {
  func.func @kernel(%arg0: memref<16x24xbf16, #tpu.memory_space<vmem>>, %arg1: memref<16x96xbf16, #tpu.memory_space<vmem>>, %arg2: memref<16x16xbf16, #tpu.memory_space<vmem>>, %arg3: memref<24x32xbf16, #tpu.memory_space<vmem>>, %arg4: memref<1x32xf32, #tpu.memory_space<vmem>>, %arg5: memref<32x32xbf16, #tpu.memory_space<vmem>>, %arg6: memref<96x32xbf16, #tpu.memory_space<vmem>>, %arg7: memref<1x32xf32, #tpu.memory_space<vmem>>, %arg8: memref<2x1x32xf32, #tpu.memory_space<vmem>>, %arg9: memref<2x1x32xf32, #tpu.memory_space<vmem>>, %arg10: memref<4x1x16xf32, #tpu.memory_space<vmem>>, %arg11: memref<4x1x16xf32, #tpu.memory_space<vmem>>, %arg12: memref<4x16x16xbf16, #tpu.memory_space<vmem>>, %arg13: memref<4x16x16xbf16, #tpu.memory_space<vmem>>, %arg14: memref<4x1x16xf32, #tpu.memory_space<vmem>>, %arg15: memref<2x1x32xf32, #tpu.memory_space<vmem>>, %arg16: memref<2x1x32xf32, #tpu.memory_space<vmem>>, %arg17: memref<16x32xf32, #tpu.memory_space<vmem>>) attributes {dimension_semantics = [], scalar_prefetch = 0 : i64, scratch_operands = 0 : i64, tpu.core_type = #tpu.core_type<tc>} {
    %c0 = arith.constant 0 : index
    %c0_0 = arith.constant 0 : index
    %0 = vector.load %arg0[%c0, %c0_0] : memref<16x24xbf16, #tpu.memory_space<vmem>>, vector<16x24xbf16>
    %c0_1 = arith.constant 0 : index
    %c0_2 = arith.constant 0 : index
    %1 = vector.load %arg3[%c0_1, %c0_2] : memref<24x32xbf16, #tpu.memory_space<vmem>>, vector<24x32xbf16>
    %cst = arith.constant dense<0.000000e+00> : vector<16x32xf32>
    %2 = tpu.matmul %0, %1, %cst {dimension_numbers = #tpu.dot_dimension_numbers<[1], [0], [0], [1], [0, 0, 1, 1], [], []>} : vector<16x24xbf16>, vector<24x32xbf16>, vector<16x32xf32> -> vector<16x32xf32>
    %c0_3 = arith.constant 0 : index
    %c0_4 = arith.constant 0 : index
    %3 = vector.load %arg4[%c0_3, %c0_4] : memref<1x32xf32, #tpu.memory_space<vmem>>, vector<1x32xf32>
    %4 = vector.broadcast %3 : vector<1x32xf32> to vector<16x32xf32>
    %5 = arith.addf %2, %4 : vector<16x32xf32>
    %6 = arith.truncf %5 : vector<16x32xf32> to vector<16x32xbf16>
    %c0_5 = arith.constant 0 : index
    %c0_6 = arith.constant 0 : index
    %7 = vector.load %arg5[%c0_5, %c0_6] : memref<32x32xbf16, #tpu.memory_space<vmem>>, vector<32x32xbf16>
    %cst_7 = arith.constant dense<0.000000e+00> : vector<16x32xf32>
    %8 = tpu.matmul %6, %7, %cst_7 {dimension_numbers = #tpu.dot_dimension_numbers<[1], [0], [0], [1], [0, 0, 1, 1], [], []>} : vector<16x32xbf16>, vector<32x32xbf16>, vector<16x32xf32> -> vector<16x32xf32>
    %c0_8 = arith.constant 0 : index
    %c0_9 = arith.constant 0 : index
    %9 = vector.load %arg1[%c0_8, %c0_9] : memref<16x96xbf16, #tpu.memory_space<vmem>>, vector<16x96xbf16>
    %c0_10 = arith.constant 0 : index
    %c0_11 = arith.constant 0 : index
    %10 = vector.load %arg6[%c0_10, %c0_11] : memref<96x32xbf16, #tpu.memory_space<vmem>>, vector<96x32xbf16>
    %cst_12 = arith.constant dense<0.000000e+00> : vector<16x32xf32>
    %11 = tpu.matmul %9, %10, %cst_12 {dimension_numbers = #tpu.dot_dimension_numbers<[1], [0], [0], [1], [0, 0, 1, 1], [], []>} : vector<16x96xbf16>, vector<96x32xbf16>, vector<16x32xf32> -> vector<16x32xf32>
    %12 = arith.addf %8, %11 : vector<16x32xf32>
    %c0_13 = arith.constant 0 : index
    %c0_14 = arith.constant 0 : index
    %13 = vector.load %arg7[%c0_13, %c0_14] : memref<1x32xf32, #tpu.memory_space<vmem>>, vector<1x32xf32>
    %14 = vector.broadcast %13 : vector<1x32xf32> to vector<16x32xf32>
    %15 = arith.addf %12, %14 : vector<16x32xf32>
    %c0_15 = arith.constant 0 : index
    %c0_16 = arith.constant 0 : index
    %16 = vector.load %arg2[%c0_15, %c0_16] : memref<16x16xbf16, #tpu.memory_space<vmem>>, vector<16x16xbf16>
    %c0_17 = arith.constant 0 : index
    %c0_18 = arith.constant 0 : index
    %c0_19 = arith.constant 0 : index
    %17 = vector.load %arg8[%c0_17, %c0_18, %c0_19] : memref<2x1x32xf32, #tpu.memory_space<vmem>>, vector<1x1x32xf32>
    %18 = vector.shape_cast %17 : vector<1x1x32xf32> to vector<1x32xf32>
    %c0_20 = arith.constant 0 : index
    %c0_21 = arith.constant 0 : index
    %c0_22 = arith.constant 0 : index
    %19 = vector.load %arg9[%c0_20, %c0_21, %c0_22] : memref<2x1x32xf32, #tpu.memory_space<vmem>>, vector<1x1x32xf32>
    %20 = vector.shape_cast %19 : vector<1x1x32xf32> to vector<1x32xf32>
    %cst_23 = arith.constant dense<0.000000e+00> : vector<16xf32>
    %21 = vector.multi_reduction <add>, %15, %cst_23 [1] : vector<16x32xf32> to vector<16xf32>
    %22 = vector.shape_cast %21 : vector<16xf32> to vector<16x1xf32>
    %cst_24 = arith.constant 3.200000e+01 : f32
    %23 = vector.broadcast %cst_24 : f32 to vector<16x1xf32>
    %24 = arith.divf %22, %23 : vector<16x1xf32>
    %25 = vector.broadcast %24 : vector<16x1xf32> to vector<16x32xf32>
    %26 = arith.subf %15, %25 : vector<16x32xf32>
    %27 = arith.mulf %26, %26 : vector<16x32xf32>
    %cst_25 = arith.constant dense<0.000000e+00> : vector<16xf32>
    %28 = vector.multi_reduction <add>, %27, %cst_25 [1] : vector<16x32xf32> to vector<16xf32>
    %29 = vector.shape_cast %28 : vector<16xf32> to vector<16x1xf32>
    %cst_26 = arith.constant 3.200000e+01 : f32
    %30 = vector.broadcast %cst_26 : f32 to vector<16x1xf32>
    %31 = arith.divf %29, %30 : vector<16x1xf32>
    %32 = vector.broadcast %24 : vector<16x1xf32> to vector<16x32xf32>
    %33 = arith.subf %15, %32 : vector<16x32xf32>
    %cst_27 = arith.constant 9.99999974E-6 : f32
    %34 = vector.broadcast %cst_27 : f32 to vector<16x1xf32>
    %35 = arith.addf %31, %34 : vector<16x1xf32>
    %36 = math.rsqrt %35 : vector<16x1xf32>
    %37 = vector.broadcast %36 : vector<16x1xf32> to vector<16x32xf32>
    %38 = arith.mulf %33, %37 : vector<16x32xf32>
    %39 = vector.broadcast %18 : vector<1x32xf32> to vector<16x32xf32>
    %40 = arith.mulf %38, %39 : vector<16x32xf32>
    %41 = vector.broadcast %20 : vector<1x32xf32> to vector<16x32xf32>
    %42 = arith.addf %40, %41 : vector<16x32xf32>
    %cst_28 = arith.constant 5.000000e-01 : f32
    %43 = vector.broadcast %cst_28 : f32 to vector<16x32xf32>
    %44 = arith.mulf %43, %42 : vector<16x32xf32>
    %cst_29 = arith.constant 0.707106769 : f32
    %45 = vector.broadcast %cst_29 : f32 to vector<16x32xf32>
    %46 = arith.mulf %42, %45 : vector<16x32xf32>
    %47 = math.erf %46 : vector<16x32xf32>
    %cst_30 = arith.constant 1.000000e+00 : f32
    %48 = vector.broadcast %cst_30 : f32 to vector<16x32xf32>
    %49 = arith.addf %48, %47 : vector<16x32xf32>
    %50 = arith.mulf %44, %49 : vector<16x32xf32>
    %51 = vector.extract_strided_slice %50 {offsets = [0, 0], sizes = [16, 16], strides = [1, 1]} : vector<16x32xf32> to vector<16x16xf32>
    %52 = vector.extract_strided_slice %50 {offsets = [0, 16], sizes = [16, 16], strides = [1, 1]} : vector<16x32xf32> to vector<16x16xf32>
    %c0_31 = arith.constant 0 : index
    %c0_32 = arith.constant 0 : index
    %c0_33 = arith.constant 0 : index
    %53 = vector.load %arg10[%c0_31, %c0_32, %c0_33] : memref<4x1x16xf32, #tpu.memory_space<vmem>>, vector<1x1x16xf32>
    %54 = vector.shape_cast %53 : vector<1x1x16xf32> to vector<1x16xf32>
    %c0_34 = arith.constant 0 : index
    %c0_35 = arith.constant 0 : index
    %c0_36 = arith.constant 0 : index
    %55 = vector.load %arg11[%c0_34, %c0_35, %c0_36] : memref<4x1x16xf32, #tpu.memory_space<vmem>>, vector<1x1x16xf32>
    %56 = vector.shape_cast %55 : vector<1x1x16xf32> to vector<1x16xf32>
    %cst_37 = arith.constant dense<0.000000e+00> : vector<16xf32>
    %57 = vector.multi_reduction <add>, %52, %cst_37 [1] : vector<16x16xf32> to vector<16xf32>
    %58 = vector.shape_cast %57 : vector<16xf32> to vector<16x1xf32>
    %cst_38 = arith.constant 1.600000e+01 : f32
    %59 = vector.broadcast %cst_38 : f32 to vector<16x1xf32>
    %60 = arith.divf %58, %59 : vector<16x1xf32>
    %61 = vector.broadcast %60 : vector<16x1xf32> to vector<16x16xf32>
    %62 = arith.subf %52, %61 : vector<16x16xf32>
    %63 = arith.mulf %62, %62 : vector<16x16xf32>
    %cst_39 = arith.constant dense<0.000000e+00> : vector<16xf32>
    %64 = vector.multi_reduction <add>, %63, %cst_39 [1] : vector<16x16xf32> to vector<16xf32>
    %65 = vector.shape_cast %64 : vector<16xf32> to vector<16x1xf32>
    %cst_40 = arith.constant 1.600000e+01 : f32
    %66 = vector.broadcast %cst_40 : f32 to vector<16x1xf32>
    %67 = arith.divf %65, %66 : vector<16x1xf32>
    %68 = vector.broadcast %60 : vector<16x1xf32> to vector<16x16xf32>
    %69 = arith.subf %52, %68 : vector<16x16xf32>
    %cst_41 = arith.constant 9.99999974E-6 : f32
    %70 = vector.broadcast %cst_41 : f32 to vector<16x1xf32>
    %71 = arith.addf %67, %70 : vector<16x1xf32>
    %72 = math.rsqrt %71 : vector<16x1xf32>
    %73 = vector.broadcast %72 : vector<16x1xf32> to vector<16x16xf32>
    %74 = arith.mulf %69, %73 : vector<16x16xf32>
    %75 = vector.broadcast %54 : vector<1x16xf32> to vector<16x16xf32>
    %76 = arith.mulf %74, %75 : vector<16x16xf32>
    %77 = vector.broadcast %56 : vector<1x16xf32> to vector<16x16xf32>
    %78 = arith.addf %76, %77 : vector<16x16xf32>
    %cst_42 = arith.constant 0.000000e+00 : f32
    %79 = vector.broadcast %cst_42 : f32 to vector<16x16xf32>
    %80 = arith.maximumf %78, %79 : vector<16x16xf32>
    %81 = arith.truncf %80 : vector<16x16xf32> to vector<16x16xbf16>
    %cst_43 = arith.constant dense<0.000000e+00> : vector<16x16xf32>
    %82 = tpu.matmul %16, %81, %cst_43 {dimension_numbers = #tpu.dot_dimension_numbers<[1], [0], [0], [1], [0, 0, 1, 1], [], []>} : vector<16x16xbf16>, vector<16x16xbf16>, vector<16x16xf32> -> vector<16x16xf32>
    %83 = arith.truncf %82 : vector<16x16xf32> to vector<16x16xbf16>
    %c0_44 = arith.constant 0 : index
    %c0_45 = arith.constant 0 : index
    %c0_46 = arith.constant 0 : index
    %84 = vector.load %arg12[%c0_44, %c0_45, %c0_46] : memref<4x16x16xbf16, #tpu.memory_space<vmem>>, vector<1x16x16xbf16>
    %85 = vector.shape_cast %84 : vector<1x16x16xbf16> to vector<16x16xbf16>
    %cst_47 = arith.constant dense<0.000000e+00> : vector<16x16xf32>
    %86 = tpu.matmul %83, %85, %cst_47 {dimension_numbers = #tpu.dot_dimension_numbers<[1], [0], [0], [1], [0, 0, 1, 1], [], []>} : vector<16x16xbf16>, vector<16x16xbf16>, vector<16x16xf32> -> vector<16x16xf32>
    %c0_48 = arith.constant 0 : index
    %c0_49 = arith.constant 0 : index
    %c0_50 = arith.constant 0 : index
    %87 = vector.load %arg13[%c0_48, %c0_49, %c0_50] : memref<4x16x16xbf16, #tpu.memory_space<vmem>>, vector<1x16x16xbf16>
    %88 = vector.shape_cast %87 : vector<1x16x16xbf16> to vector<16x16xbf16>
    %cst_51 = arith.constant dense<0.000000e+00> : vector<16x16xf32>
    %89 = tpu.matmul %81, %88, %cst_51 {dimension_numbers = #tpu.dot_dimension_numbers<[1], [0], [0], [1], [0, 0, 1, 1], [], []>} : vector<16x16xbf16>, vector<16x16xbf16>, vector<16x16xf32> -> vector<16x16xf32>
    %90 = arith.addf %86, %89 : vector<16x16xf32>
    %c0_52 = arith.constant 0 : index
    %c0_53 = arith.constant 0 : index
    %c0_54 = arith.constant 0 : index
    %91 = vector.load %arg14[%c0_52, %c0_53, %c0_54] : memref<4x1x16xf32, #tpu.memory_space<vmem>>, vector<1x1x16xf32>
    %92 = vector.shape_cast %91 : vector<1x1x16xf32> to vector<1x16xf32>
    %93 = vector.broadcast %92 : vector<1x16xf32> to vector<16x16xf32>
    %94 = arith.addf %90, %93 : vector<16x16xf32>
    %95 = arith.addf %51, %94 : vector<16x16xf32>
    %c1 = arith.constant 1 : index
    %c0_55 = arith.constant 0 : index
    %c0_56 = arith.constant 0 : index
    %96 = vector.load %arg10[%c1, %c0_55, %c0_56] : memref<4x1x16xf32, #tpu.memory_space<vmem>>, vector<1x1x16xf32>
    %97 = vector.shape_cast %96 : vector<1x1x16xf32> to vector<1x16xf32>
    %c1_57 = arith.constant 1 : index
    %c0_58 = arith.constant 0 : index
    %c0_59 = arith.constant 0 : index
    %98 = vector.load %arg11[%c1_57, %c0_58, %c0_59] : memref<4x1x16xf32, #tpu.memory_space<vmem>>, vector<1x1x16xf32>
    %99 = vector.shape_cast %98 : vector<1x1x16xf32> to vector<1x16xf32>
    %cst_60 = arith.constant dense<0.000000e+00> : vector<16xf32>
    %100 = vector.multi_reduction <add>, %95, %cst_60 [1] : vector<16x16xf32> to vector<16xf32>
    %101 = vector.shape_cast %100 : vector<16xf32> to vector<16x1xf32>
    %cst_61 = arith.constant 1.600000e+01 : f32
    %102 = vector.broadcast %cst_61 : f32 to vector<16x1xf32>
    %103 = arith.divf %101, %102 : vector<16x1xf32>
    %104 = vector.broadcast %103 : vector<16x1xf32> to vector<16x16xf32>
    %105 = arith.subf %95, %104 : vector<16x16xf32>
    %106 = arith.mulf %105, %105 : vector<16x16xf32>
    %cst_62 = arith.constant dense<0.000000e+00> : vector<16xf32>
    %107 = vector.multi_reduction <add>, %106, %cst_62 [1] : vector<16x16xf32> to vector<16xf32>
    %108 = vector.shape_cast %107 : vector<16xf32> to vector<16x1xf32>
    %cst_63 = arith.constant 1.600000e+01 : f32
    %109 = vector.broadcast %cst_63 : f32 to vector<16x1xf32>
    %110 = arith.divf %108, %109 : vector<16x1xf32>
    %111 = vector.broadcast %103 : vector<16x1xf32> to vector<16x16xf32>
    %112 = arith.subf %95, %111 : vector<16x16xf32>
    %cst_64 = arith.constant 9.99999974E-6 : f32
    %113 = vector.broadcast %cst_64 : f32 to vector<16x1xf32>
    %114 = arith.addf %110, %113 : vector<16x1xf32>
    %115 = math.rsqrt %114 : vector<16x1xf32>
    %116 = vector.broadcast %115 : vector<16x1xf32> to vector<16x16xf32>
    %117 = arith.mulf %112, %116 : vector<16x16xf32>
    %118 = vector.broadcast %97 : vector<1x16xf32> to vector<16x16xf32>
    %119 = arith.mulf %117, %118 : vector<16x16xf32>
    %120 = vector.broadcast %99 : vector<1x16xf32> to vector<16x16xf32>
    %121 = arith.addf %119, %120 : vector<16x16xf32>
    %cst_65 = arith.constant 0.000000e+00 : f32
    %122 = vector.broadcast %cst_65 : f32 to vector<16x16xf32>
    %123 = arith.maximumf %121, %122 : vector<16x16xf32>
    %124 = arith.truncf %123 : vector<16x16xf32> to vector<16x16xbf16>
    %cst_66 = arith.constant dense<0.000000e+00> : vector<16x16xf32>
    %125 = tpu.matmul %16, %124, %cst_66 {dimension_numbers = #tpu.dot_dimension_numbers<[1], [0], [0], [1], [0, 0, 1, 1], [], []>} : vector<16x16xbf16>, vector<16x16xbf16>, vector<16x16xf32> -> vector<16x16xf32>
    %126 = arith.truncf %125 : vector<16x16xf32> to vector<16x16xbf16>
    %c1_67 = arith.constant 1 : index
    %c0_68 = arith.constant 0 : index
    %c0_69 = arith.constant 0 : index
    %127 = vector.load %arg12[%c1_67, %c0_68, %c0_69] : memref<4x16x16xbf16, #tpu.memory_space<vmem>>, vector<1x16x16xbf16>
    %128 = vector.shape_cast %127 : vector<1x16x16xbf16> to vector<16x16xbf16>
    %cst_70 = arith.constant dense<0.000000e+00> : vector<16x16xf32>
    %129 = tpu.matmul %126, %128, %cst_70 {dimension_numbers = #tpu.dot_dimension_numbers<[1], [0], [0], [1], [0, 0, 1, 1], [], []>} : vector<16x16xbf16>, vector<16x16xbf16>, vector<16x16xf32> -> vector<16x16xf32>
    %c1_71 = arith.constant 1 : index
    %c0_72 = arith.constant 0 : index
    %c0_73 = arith.constant 0 : index
    %130 = vector.load %arg13[%c1_71, %c0_72, %c0_73] : memref<4x16x16xbf16, #tpu.memory_space<vmem>>, vector<1x16x16xbf16>
    %131 = vector.shape_cast %130 : vector<1x16x16xbf16> to vector<16x16xbf16>
    %cst_74 = arith.constant dense<0.000000e+00> : vector<16x16xf32>
    %132 = tpu.matmul %124, %131, %cst_74 {dimension_numbers = #tpu.dot_dimension_numbers<[1], [0], [0], [1], [0, 0, 1, 1], [], []>} : vector<16x16xbf16>, vector<16x16xbf16>, vector<16x16xf32> -> vector<16x16xf32>
    %133 = arith.addf %129, %132 : vector<16x16xf32>
    %c1_75 = arith.constant 1 : index
    %c0_76 = arith.constant 0 : index
    %c0_77 = arith.constant 0 : index
    %134 = vector.load %arg14[%c1_75, %c0_76, %c0_77] : memref<4x1x16xf32, #tpu.memory_space<vmem>>, vector<1x1x16xf32>
    %135 = vector.shape_cast %134 : vector<1x1x16xf32> to vector<1x16xf32>
    %136 = vector.broadcast %135 : vector<1x16xf32> to vector<16x16xf32>
    %137 = arith.addf %133, %136 : vector<16x16xf32>
    %138 = arith.addf %52, %137 : vector<16x16xf32>
    %139 = tpu.concatenate %95, %138 in 1 : vector<16x16xf32>, vector<16x16xf32> -> vector<16x32xf32>
    %140 = arith.addf %139, %15 : vector<16x32xf32>
    %c0_78 = arith.constant 0 : index
    %c0_79 = arith.constant 0 : index
    %c0_80 = arith.constant 0 : index
    %141 = vector.load %arg15[%c0_78, %c0_79, %c0_80] : memref<2x1x32xf32, #tpu.memory_space<vmem>>, vector<1x1x32xf32>
    %142 = vector.shape_cast %141 : vector<1x1x32xf32> to vector<1x32xf32>
    %c0_81 = arith.constant 0 : index
    %c0_82 = arith.constant 0 : index
    %c0_83 = arith.constant 0 : index
    %143 = vector.load %arg16[%c0_81, %c0_82, %c0_83] : memref<2x1x32xf32, #tpu.memory_space<vmem>>, vector<1x1x32xf32>
    %144 = vector.shape_cast %143 : vector<1x1x32xf32> to vector<1x32xf32>
    %cst_84 = arith.constant dense<0.000000e+00> : vector<16xf32>
    %145 = vector.multi_reduction <add>, %140, %cst_84 [1] : vector<16x32xf32> to vector<16xf32>
    %146 = vector.shape_cast %145 : vector<16xf32> to vector<16x1xf32>
    %cst_85 = arith.constant 3.200000e+01 : f32
    %147 = vector.broadcast %cst_85 : f32 to vector<16x1xf32>
    %148 = arith.divf %146, %147 : vector<16x1xf32>
    %149 = vector.broadcast %148 : vector<16x1xf32> to vector<16x32xf32>
    %150 = arith.subf %140, %149 : vector<16x32xf32>
    %151 = arith.mulf %150, %150 : vector<16x32xf32>
    %cst_86 = arith.constant dense<0.000000e+00> : vector<16xf32>
    %152 = vector.multi_reduction <add>, %151, %cst_86 [1] : vector<16x32xf32> to vector<16xf32>
    %153 = vector.shape_cast %152 : vector<16xf32> to vector<16x1xf32>
    %cst_87 = arith.constant 3.200000e+01 : f32
    %154 = vector.broadcast %cst_87 : f32 to vector<16x1xf32>
    %155 = arith.divf %153, %154 : vector<16x1xf32>
    %156 = vector.broadcast %148 : vector<16x1xf32> to vector<16x32xf32>
    %157 = arith.subf %140, %156 : vector<16x32xf32>
    %cst_88 = arith.constant 9.99999974E-6 : f32
    %158 = vector.broadcast %cst_88 : f32 to vector<16x1xf32>
    %159 = arith.addf %155, %158 : vector<16x1xf32>
    %160 = math.rsqrt %159 : vector<16x1xf32>
    %161 = vector.broadcast %160 : vector<16x1xf32> to vector<16x32xf32>
    %162 = arith.mulf %157, %161 : vector<16x32xf32>
    %163 = vector.broadcast %142 : vector<1x32xf32> to vector<16x32xf32>
    %164 = arith.mulf %162, %163 : vector<16x32xf32>
    %165 = vector.broadcast %144 : vector<1x32xf32> to vector<16x32xf32>
    %166 = arith.addf %164, %165 : vector<16x32xf32>
    %c1_89 = arith.constant 1 : index
    %c0_90 = arith.constant 0 : index
    %c0_91 = arith.constant 0 : index
    %167 = vector.load %arg8[%c1_89, %c0_90, %c0_91] : memref<2x1x32xf32, #tpu.memory_space<vmem>>, vector<1x1x32xf32>
    %168 = vector.shape_cast %167 : vector<1x1x32xf32> to vector<1x32xf32>
    %c1_92 = arith.constant 1 : index
    %c0_93 = arith.constant 0 : index
    %c0_94 = arith.constant 0 : index
    %169 = vector.load %arg9[%c1_92, %c0_93, %c0_94] : memref<2x1x32xf32, #tpu.memory_space<vmem>>, vector<1x1x32xf32>
    %170 = vector.shape_cast %169 : vector<1x1x32xf32> to vector<1x32xf32>
    %cst_95 = arith.constant dense<0.000000e+00> : vector<16xf32>
    %171 = vector.multi_reduction <add>, %166, %cst_95 [1] : vector<16x32xf32> to vector<16xf32>
    %172 = vector.shape_cast %171 : vector<16xf32> to vector<16x1xf32>
    %cst_96 = arith.constant 3.200000e+01 : f32
    %173 = vector.broadcast %cst_96 : f32 to vector<16x1xf32>
    %174 = arith.divf %172, %173 : vector<16x1xf32>
    %175 = vector.broadcast %174 : vector<16x1xf32> to vector<16x32xf32>
    %176 = arith.subf %166, %175 : vector<16x32xf32>
    %177 = arith.mulf %176, %176 : vector<16x32xf32>
    %cst_97 = arith.constant dense<0.000000e+00> : vector<16xf32>
    %178 = vector.multi_reduction <add>, %177, %cst_97 [1] : vector<16x32xf32> to vector<16xf32>
    %179 = vector.shape_cast %178 : vector<16xf32> to vector<16x1xf32>
    %cst_98 = arith.constant 3.200000e+01 : f32
    %180 = vector.broadcast %cst_98 : f32 to vector<16x1xf32>
    %181 = arith.divf %179, %180 : vector<16x1xf32>
    %182 = vector.broadcast %174 : vector<16x1xf32> to vector<16x32xf32>
    %183 = arith.subf %166, %182 : vector<16x32xf32>
    %cst_99 = arith.constant 9.99999974E-6 : f32
    %184 = vector.broadcast %cst_99 : f32 to vector<16x1xf32>
    %185 = arith.addf %181, %184 : vector<16x1xf32>
    %186 = math.rsqrt %185 : vector<16x1xf32>
    %187 = vector.broadcast %186 : vector<16x1xf32> to vector<16x32xf32>
    %188 = arith.mulf %183, %187 : vector<16x32xf32>
    %189 = vector.broadcast %168 : vector<1x32xf32> to vector<16x32xf32>
    %190 = arith.mulf %188, %189 : vector<16x32xf32>
    %191 = vector.broadcast %170 : vector<1x32xf32> to vector<16x32xf32>
    %192 = arith.addf %190, %191 : vector<16x32xf32>
    %cst_100 = arith.constant 5.000000e-01 : f32
    %193 = vector.broadcast %cst_100 : f32 to vector<16x32xf32>
    %194 = arith.mulf %193, %192 : vector<16x32xf32>
    %cst_101 = arith.constant 0.707106769 : f32
    %195 = vector.broadcast %cst_101 : f32 to vector<16x32xf32>
    %196 = arith.mulf %192, %195 : vector<16x32xf32>
    %197 = math.erf %196 : vector<16x32xf32>
    %cst_102 = arith.constant 1.000000e+00 : f32
    %198 = vector.broadcast %cst_102 : f32 to vector<16x32xf32>
    %199 = arith.addf %198, %197 : vector<16x32xf32>
    %200 = arith.mulf %194, %199 : vector<16x32xf32>
    %201 = vector.extract_strided_slice %200 {offsets = [0, 0], sizes = [16, 16], strides = [1, 1]} : vector<16x32xf32> to vector<16x16xf32>
    %202 = vector.extract_strided_slice %200 {offsets = [0, 16], sizes = [16, 16], strides = [1, 1]} : vector<16x32xf32> to vector<16x16xf32>
    %c2 = arith.constant 2 : index
    %c0_103 = arith.constant 0 : index
    %c0_104 = arith.constant 0 : index
    %203 = vector.load %arg10[%c2, %c0_103, %c0_104] : memref<4x1x16xf32, #tpu.memory_space<vmem>>, vector<1x1x16xf32>
    %204 = vector.shape_cast %203 : vector<1x1x16xf32> to vector<1x16xf32>
    %c2_105 = arith.constant 2 : index
    %c0_106 = arith.constant 0 : index
    %c0_107 = arith.constant 0 : index
    %205 = vector.load %arg11[%c2_105, %c0_106, %c0_107] : memref<4x1x16xf32, #tpu.memory_space<vmem>>, vector<1x1x16xf32>
    %206 = vector.shape_cast %205 : vector<1x1x16xf32> to vector<1x16xf32>
    %cst_108 = arith.constant dense<0.000000e+00> : vector<16xf32>
    %207 = vector.multi_reduction <add>, %202, %cst_108 [1] : vector<16x16xf32> to vector<16xf32>
    %208 = vector.shape_cast %207 : vector<16xf32> to vector<16x1xf32>
    %cst_109 = arith.constant 1.600000e+01 : f32
    %209 = vector.broadcast %cst_109 : f32 to vector<16x1xf32>
    %210 = arith.divf %208, %209 : vector<16x1xf32>
    %211 = vector.broadcast %210 : vector<16x1xf32> to vector<16x16xf32>
    %212 = arith.subf %202, %211 : vector<16x16xf32>
    %213 = arith.mulf %212, %212 : vector<16x16xf32>
    %cst_110 = arith.constant dense<0.000000e+00> : vector<16xf32>
    %214 = vector.multi_reduction <add>, %213, %cst_110 [1] : vector<16x16xf32> to vector<16xf32>
    %215 = vector.shape_cast %214 : vector<16xf32> to vector<16x1xf32>
    %cst_111 = arith.constant 1.600000e+01 : f32
    %216 = vector.broadcast %cst_111 : f32 to vector<16x1xf32>
    %217 = arith.divf %215, %216 : vector<16x1xf32>
    %218 = vector.broadcast %210 : vector<16x1xf32> to vector<16x16xf32>
    %219 = arith.subf %202, %218 : vector<16x16xf32>
    %cst_112 = arith.constant 9.99999974E-6 : f32
    %220 = vector.broadcast %cst_112 : f32 to vector<16x1xf32>
    %221 = arith.addf %217, %220 : vector<16x1xf32>
    %222 = math.rsqrt %221 : vector<16x1xf32>
    %223 = vector.broadcast %222 : vector<16x1xf32> to vector<16x16xf32>
    %224 = arith.mulf %219, %223 : vector<16x16xf32>
    %225 = vector.broadcast %204 : vector<1x16xf32> to vector<16x16xf32>
    %226 = arith.mulf %224, %225 : vector<16x16xf32>
    %227 = vector.broadcast %206 : vector<1x16xf32> to vector<16x16xf32>
    %228 = arith.addf %226, %227 : vector<16x16xf32>
    %cst_113 = arith.constant 0.000000e+00 : f32
    %229 = vector.broadcast %cst_113 : f32 to vector<16x16xf32>
    %230 = arith.maximumf %228, %229 : vector<16x16xf32>
    %231 = arith.truncf %230 : vector<16x16xf32> to vector<16x16xbf16>
    %cst_114 = arith.constant dense<0.000000e+00> : vector<16x16xf32>
    %232 = tpu.matmul %16, %231, %cst_114 {dimension_numbers = #tpu.dot_dimension_numbers<[1], [0], [0], [1], [0, 0, 1, 1], [], []>} : vector<16x16xbf16>, vector<16x16xbf16>, vector<16x16xf32> -> vector<16x16xf32>
    %233 = arith.truncf %232 : vector<16x16xf32> to vector<16x16xbf16>
    %c2_115 = arith.constant 2 : index
    %c0_116 = arith.constant 0 : index
    %c0_117 = arith.constant 0 : index
    %234 = vector.load %arg12[%c2_115, %c0_116, %c0_117] : memref<4x16x16xbf16, #tpu.memory_space<vmem>>, vector<1x16x16xbf16>
    %235 = vector.shape_cast %234 : vector<1x16x16xbf16> to vector<16x16xbf16>
    %cst_118 = arith.constant dense<0.000000e+00> : vector<16x16xf32>
    %236 = tpu.matmul %233, %235, %cst_118 {dimension_numbers = #tpu.dot_dimension_numbers<[1], [0], [0], [1], [0, 0, 1, 1], [], []>} : vector<16x16xbf16>, vector<16x16xbf16>, vector<16x16xf32> -> vector<16x16xf32>
    %c2_119 = arith.constant 2 : index
    %c0_120 = arith.constant 0 : index
    %c0_121 = arith.constant 0 : index
    %237 = vector.load %arg13[%c2_119, %c0_120, %c0_121] : memref<4x16x16xbf16, #tpu.memory_space<vmem>>, vector<1x16x16xbf16>
    %238 = vector.shape_cast %237 : vector<1x16x16xbf16> to vector<16x16xbf16>
    %cst_122 = arith.constant dense<0.000000e+00> : vector<16x16xf32>
    %239 = tpu.matmul %231, %238, %cst_122 {dimension_numbers = #tpu.dot_dimension_numbers<[1], [0], [0], [1], [0, 0, 1, 1], [], []>} : vector<16x16xbf16>, vector<16x16xbf16>, vector<16x16xf32> -> vector<16x16xf32>
    %240 = arith.addf %236, %239 : vector<16x16xf32>
    %c2_123 = arith.constant 2 : index
    %c0_124 = arith.constant 0 : index
    %c0_125 = arith.constant 0 : index
    %241 = vector.load %arg14[%c2_123, %c0_124, %c0_125] : memref<4x1x16xf32, #tpu.memory_space<vmem>>, vector<1x1x16xf32>
    %242 = vector.shape_cast %241 : vector<1x1x16xf32> to vector<1x16xf32>
    %243 = vector.broadcast %242 : vector<1x16xf32> to vector<16x16xf32>
    %244 = arith.addf %240, %243 : vector<16x16xf32>
    %245 = arith.addf %201, %244 : vector<16x16xf32>
    %c3 = arith.constant 3 : index
    %c0_126 = arith.constant 0 : index
    %c0_127 = arith.constant 0 : index
    %246 = vector.load %arg10[%c3, %c0_126, %c0_127] : memref<4x1x16xf32, #tpu.memory_space<vmem>>, vector<1x1x16xf32>
    %247 = vector.shape_cast %246 : vector<1x1x16xf32> to vector<1x16xf32>
    %c3_128 = arith.constant 3 : index
    %c0_129 = arith.constant 0 : index
    %c0_130 = arith.constant 0 : index
    %248 = vector.load %arg11[%c3_128, %c0_129, %c0_130] : memref<4x1x16xf32, #tpu.memory_space<vmem>>, vector<1x1x16xf32>
    %249 = vector.shape_cast %248 : vector<1x1x16xf32> to vector<1x16xf32>
    %cst_131 = arith.constant dense<0.000000e+00> : vector<16xf32>
    %250 = vector.multi_reduction <add>, %245, %cst_131 [1] : vector<16x16xf32> to vector<16xf32>
    %251 = vector.shape_cast %250 : vector<16xf32> to vector<16x1xf32>
    %cst_132 = arith.constant 1.600000e+01 : f32
    %252 = vector.broadcast %cst_132 : f32 to vector<16x1xf32>
    %253 = arith.divf %251, %252 : vector<16x1xf32>
    %254 = vector.broadcast %253 : vector<16x1xf32> to vector<16x16xf32>
    %255 = arith.subf %245, %254 : vector<16x16xf32>
    %256 = arith.mulf %255, %255 : vector<16x16xf32>
    %cst_133 = arith.constant dense<0.000000e+00> : vector<16xf32>
    %257 = vector.multi_reduction <add>, %256, %cst_133 [1] : vector<16x16xf32> to vector<16xf32>
    %258 = vector.shape_cast %257 : vector<16xf32> to vector<16x1xf32>
    %cst_134 = arith.constant 1.600000e+01 : f32
    %259 = vector.broadcast %cst_134 : f32 to vector<16x1xf32>
    %260 = arith.divf %258, %259 : vector<16x1xf32>
    %261 = vector.broadcast %253 : vector<16x1xf32> to vector<16x16xf32>
    %262 = arith.subf %245, %261 : vector<16x16xf32>
    %cst_135 = arith.constant 9.99999974E-6 : f32
    %263 = vector.broadcast %cst_135 : f32 to vector<16x1xf32>
    %264 = arith.addf %260, %263 : vector<16x1xf32>
    %265 = math.rsqrt %264 : vector<16x1xf32>
    %266 = vector.broadcast %265 : vector<16x1xf32> to vector<16x16xf32>
    %267 = arith.mulf %262, %266 : vector<16x16xf32>
    %268 = vector.broadcast %247 : vector<1x16xf32> to vector<16x16xf32>
    %269 = arith.mulf %267, %268 : vector<16x16xf32>
    %270 = vector.broadcast %249 : vector<1x16xf32> to vector<16x16xf32>
    %271 = arith.addf %269, %270 : vector<16x16xf32>
    %cst_136 = arith.constant 0.000000e+00 : f32
    %272 = vector.broadcast %cst_136 : f32 to vector<16x16xf32>
    %273 = arith.maximumf %271, %272 : vector<16x16xf32>
    %274 = arith.truncf %273 : vector<16x16xf32> to vector<16x16xbf16>
    %cst_137 = arith.constant dense<0.000000e+00> : vector<16x16xf32>
    %275 = tpu.matmul %16, %274, %cst_137 {dimension_numbers = #tpu.dot_dimension_numbers<[1], [0], [0], [1], [0, 0, 1, 1], [], []>} : vector<16x16xbf16>, vector<16x16xbf16>, vector<16x16xf32> -> vector<16x16xf32>
    %276 = arith.truncf %275 : vector<16x16xf32> to vector<16x16xbf16>
    %c3_138 = arith.constant 3 : index
    %c0_139 = arith.constant 0 : index
    %c0_140 = arith.constant 0 : index
    %277 = vector.load %arg12[%c3_138, %c0_139, %c0_140] : memref<4x16x16xbf16, #tpu.memory_space<vmem>>, vector<1x16x16xbf16>
    %278 = vector.shape_cast %277 : vector<1x16x16xbf16> to vector<16x16xbf16>
    %cst_141 = arith.constant dense<0.000000e+00> : vector<16x16xf32>
    %279 = tpu.matmul %276, %278, %cst_141 {dimension_numbers = #tpu.dot_dimension_numbers<[1], [0], [0], [1], [0, 0, 1, 1], [], []>} : vector<16x16xbf16>, vector<16x16xbf16>, vector<16x16xf32> -> vector<16x16xf32>
    %c3_142 = arith.constant 3 : index
    %c0_143 = arith.constant 0 : index
    %c0_144 = arith.constant 0 : index
    %280 = vector.load %arg13[%c3_142, %c0_143, %c0_144] : memref<4x16x16xbf16, #tpu.memory_space<vmem>>, vector<1x16x16xbf16>
    %281 = vector.shape_cast %280 : vector<1x16x16xbf16> to vector<16x16xbf16>
    %cst_145 = arith.constant dense<0.000000e+00> : vector<16x16xf32>
    %282 = tpu.matmul %274, %281, %cst_145 {dimension_numbers = #tpu.dot_dimension_numbers<[1], [0], [0], [1], [0, 0, 1, 1], [], []>} : vector<16x16xbf16>, vector<16x16xbf16>, vector<16x16xf32> -> vector<16x16xf32>
    %283 = arith.addf %279, %282 : vector<16x16xf32>
    %c3_146 = arith.constant 3 : index
    %c0_147 = arith.constant 0 : index
    %c0_148 = arith.constant 0 : index
    %284 = vector.load %arg14[%c3_146, %c0_147, %c0_148] : memref<4x1x16xf32, #tpu.memory_space<vmem>>, vector<1x1x16xf32>
    %285 = vector.shape_cast %284 : vector<1x1x16xf32> to vector<1x16xf32>
    %286 = vector.broadcast %285 : vector<1x16xf32> to vector<16x16xf32>
    %287 = arith.addf %283, %286 : vector<16x16xf32>
    %288 = arith.addf %202, %287 : vector<16x16xf32>
    %289 = tpu.concatenate %245, %288 in 1 : vector<16x16xf32>, vector<16x16xf32> -> vector<16x32xf32>
    %290 = arith.addf %289, %166 : vector<16x32xf32>
    %c1_149 = arith.constant 1 : index
    %c0_150 = arith.constant 0 : index
    %c0_151 = arith.constant 0 : index
    %291 = vector.load %arg15[%c1_149, %c0_150, %c0_151] : memref<2x1x32xf32, #tpu.memory_space<vmem>>, vector<1x1x32xf32>
    %292 = vector.shape_cast %291 : vector<1x1x32xf32> to vector<1x32xf32>
    %c1_152 = arith.constant 1 : index
    %c0_153 = arith.constant 0 : index
    %c0_154 = arith.constant 0 : index
    %293 = vector.load %arg16[%c1_152, %c0_153, %c0_154] : memref<2x1x32xf32, #tpu.memory_space<vmem>>, vector<1x1x32xf32>
    %294 = vector.shape_cast %293 : vector<1x1x32xf32> to vector<1x32xf32>
    %cst_155 = arith.constant dense<0.000000e+00> : vector<16xf32>
    %295 = vector.multi_reduction <add>, %290, %cst_155 [1] : vector<16x32xf32> to vector<16xf32>
    %296 = vector.shape_cast %295 : vector<16xf32> to vector<16x1xf32>
    %cst_156 = arith.constant 3.200000e+01 : f32
    %297 = vector.broadcast %cst_156 : f32 to vector<16x1xf32>
    %298 = arith.divf %296, %297 : vector<16x1xf32>
    %299 = vector.broadcast %298 : vector<16x1xf32> to vector<16x32xf32>
    %300 = arith.subf %290, %299 : vector<16x32xf32>
    %301 = arith.mulf %300, %300 : vector<16x32xf32>
    %cst_157 = arith.constant dense<0.000000e+00> : vector<16xf32>
    %302 = vector.multi_reduction <add>, %301, %cst_157 [1] : vector<16x32xf32> to vector<16xf32>
    %303 = vector.shape_cast %302 : vector<16xf32> to vector<16x1xf32>
    %cst_158 = arith.constant 3.200000e+01 : f32
    %304 = vector.broadcast %cst_158 : f32 to vector<16x1xf32>
    %305 = arith.divf %303, %304 : vector<16x1xf32>
    %306 = vector.broadcast %298 : vector<16x1xf32> to vector<16x32xf32>
    %307 = arith.subf %290, %306 : vector<16x32xf32>
    %cst_159 = arith.constant 9.99999974E-6 : f32
    %308 = vector.broadcast %cst_159 : f32 to vector<16x1xf32>
    %309 = arith.addf %305, %308 : vector<16x1xf32>
    %310 = math.rsqrt %309 : vector<16x1xf32>
    %311 = vector.broadcast %310 : vector<16x1xf32> to vector<16x32xf32>
    %312 = arith.mulf %307, %311 : vector<16x32xf32>
    %313 = vector.broadcast %292 : vector<1x32xf32> to vector<16x32xf32>
    %314 = arith.mulf %312, %313 : vector<16x32xf32>
    %315 = vector.broadcast %294 : vector<1x32xf32> to vector<16x32xf32>
    %316 = arith.addf %314, %315 : vector<16x32xf32>
    %cst_160 = arith.constant 5.000000e-01 : f32
    %317 = vector.broadcast %cst_160 : f32 to vector<16x32xf32>
    %318 = arith.mulf %317, %316 : vector<16x32xf32>
    %cst_161 = arith.constant 0.707106769 : f32
    %319 = vector.broadcast %cst_161 : f32 to vector<16x32xf32>
    %320 = arith.mulf %316, %319 : vector<16x32xf32>
    %321 = math.erf %320 : vector<16x32xf32>
    %cst_162 = arith.constant 1.000000e+00 : f32
    %322 = vector.broadcast %cst_162 : f32 to vector<16x32xf32>
    %323 = arith.addf %322, %321 : vector<16x32xf32>
    %324 = arith.mulf %318, %323 : vector<16x32xf32>
    %c0_163 = arith.constant 0 : index
    %c0_164 = arith.constant 0 : index
    %325 = vector.load %arg17[%c0_163, %c0_164] : memref<16x32xf32, #tpu.memory_space<vmem>>, vector<16x32xf32>
    tpu.vector_store %arg17[%c0_163, %c0_164], %324 {strides = array<i32>} : memref<16x32xf32, #tpu.memory_space<vmem>>, vector<16x32xf32>,
    return
  }
}

</mosaic_0001>

<bundles_post_ra>
// kernel: custom-call.3
= control target key start
LH: loop header
LB: loop body
LE: loop exit
PB: predicated region body
PF: predicated region fallthrough
CT: control target
= control target key end

     0   :  { %s6_s0 = inlined_call_operand.vmem [shape: f32[16,16], index: 0, kind: output, shape index: {}]  }

// kernel: custom-call.2
= control target key start
LH: loop header
LB: loop body
LE: loop exit
PB: predicated region body
PF: predicated region fallthrough
CT: control target
= control target key end

     0   :  { %s6_s0 = inlined_call_operand.vmem [shape: bf16[16,16], index: 0, kind: output, shape index: {}]  }

// kernel: gspade_forward.1
= control target key start
LH: loop header
LB: loop body
LE: loop exit
PB: predicated region body
PF: predicated region fallthrough
CT: control target
= control target key end

     0   :  { %s2061_s0 = inlined_call_operand.vmem [shape: bf16[16,24], index: 0, kind: input, shape index: {}]   ;;  %s2062_s1 = inlined_call_operand.vmem [shape: bf16[16,96], index: 1, kind: input, shape index: {}]   ;;  %s2063_s2 = inlined_call_operand.vmem [shape: bf16[16,16], index: 2, kind: input, shape index: {}]   ;;  %s2064_s3 = inlined_call_operand.vmem [shape: bf16[24,32], index: 3, kind: input, shape index: {}]   ;;  %s2065_s4 = inlined_call_operand.vmem [shape: f32[1,32], index: 4, kind: input, shape index: {}]   ;;  %s2066_s5 = inlined_call_operand.vmem [shape: bf16[32,32], index: 5, kind: input, shape index: {}]   ;;  %s2067_s6 = inlined_call_operand.vmem [shape: bf16[96,32], index: 6, kind: input, shape index: {}]   ;;  %s2068_s7 = inlined_call_operand.vmem [shape: f32[1,32], index: 7, kind: input, shape index: {}]   ;;  %s2069_s8 = inlined_call_operand.vmem [shape: f32[2,1,32], index: 8, kind: input, shape index: {}]   ;;  %s2070_s9 = inlined_call_operand.vmem [shape: f32[2,1,32], index: 9, kind: input, shape index: {}]   ;;  %s2071_s10 = inlined_call_operand.vmem [shape: f32[4,1,16], index: 10, kind: input, shape index: {}]   ;;  %s2072_s11 = inlined_call_operand.vmem [shape: f32[4,1,16], index: 11, kind: input, shape index: {}]   ;;  %s2073_s12 = inlined_call_operand.vmem [shape: bf16[4,16,16], index: 12, kind: input, shape index: {}]   ;;  %s2074_s13 = inlined_call_operand.vmem [shape: bf16[4,16,16], index: 13, kind: input, shape index: {}]   ;;  %s2075_s14 = inlined_call_operand.vmem [shape: f32[4,1,16], index: 14, kind: input, shape index: {}]   ;;  %s2076_s15 = inlined_call_operand.vmem [shape: f32[2,1,32], index: 15, kind: input, shape index: {}]   ;;  %s2077_s16 = inlined_call_operand.vmem [shape: f32[2,1,32], index: 16, kind: input, shape index: {}]   ;;  %s2078_s17 = inlined_call_operand.hbm [shape: f32[16,32], index: 17, kind: output, shape index: {}]  }
   0x1   :  { %2079 = sst [smem:[#allocation5_spill]] %s2061_s0 }
   0x2   :  { %2080 = sst [smem:[#allocation6_spill]] %s2062_s1 }
   0x3   :  { %v62_v0 = vld [vmem:[%s2064_s3 + $0x8] sm:$0xf]  ;;  %vm85_vm0 = vcmask 1043456   ;;  %v1504_v3 = vld [vmem:[%s2067_s6 + $0x20] sm:$0xff]  ;;  %v1503_v7 = vld [vmem:[%s2067_s6 + $0x18] sm:$0xff]  ;;  %s2081_s21 = sld [smem:[#allocation5_spill]] }
   0x4   :  { %v77_v1 = vunpack.c.l.b16 %v62_v0  ;;  %v1505_v2 = vld [vmem:[%s2067_s6 + $0x28] sm:$0xff]  ;;  %v1496_v5 = vld [vmem:[%s2064_s3] sm:$0xff]  ;;  %vm81_vm1 = vcmask 195584  }
   0x5   :  { %169 = vmatpush.bf16.msra.mxu1 %v1505_v2 }
   0x6   :  { %v79_v4 = vpack.c.b16 %v77_v1, %v77_v1 }
   0x8   :  { %v87_v6 = vsel %vm85_vm0, %v79_v4, 0 }
   0x9   :  { %95 = vmatpush.bf16.msra.mxu0 %v87_v6  ;;  %v1495_v8 = vld [vmem:[%s2081_s21] sm:$0xff]  ;;  %170 = vmatpush.bf16.msra.mxu1 %v1504_v3 }
   0xd   :  { %96 = vmatpush.bf16.msra.mxu0 %v1496_v5 }
   0xe   :  { %22 = vsyncpa [#allocation3], 0  ;;  %171 = vmatpush.bf16.msra.mxu1 %v1503_v7  ;;  %v1502_v9 = vld [vmem:[%s2067_s6 + $0x10] sm:$0xff]  ;;  %v1501_v10 = vld [vmem:[%s2067_s6 + $0x8] sm:$0xff]  ;;  %s2082_s19 = sld [smem:[#allocation6_spill]]  ;;  %vm163_vm2 = vcmask 785408  }
   0xf   :  { %v1498_v11 = vld [vmem:[%s2066_s5 + $0x8] sm:$0xff]  ;;  %v1500_v12 = vld [vmem:[%s2067_s6] sm:$0xff]  ;;  %vm193_vm3 = vcmask 261120   ;;  %v1618_v32 = vmov 32.0   ;;  %s1619_s23 = smov 112   ;;  %s1621_s25 = smov 16  }
  0x10   :  { %1377 = vmatmul.msk.bf16.vlgmr.msra.gmra.mxu0 %vm81_vm1, %v1495_v8  ;;  %203 = vmatpush.bf16.msra.mxu2 %v1498_v11  ;;  %v1497_v13 = vld [vmem:[%s2066_s5] sm:$0xff]  ;;  %1544 = vrcp.f32 %v1618_v32 }
  0x11   :  { %v1522_v16 = vld [vmem:[%s2065_s4] ss:$0 sm:$0xff] }
  0x12   :  { %172 = vmatpush.bf16.msra.mxu1 %v1502_v9  ;;  %v1523_v22 = vld [vmem:[%s2068_s7] ss:$0 sm:$0xff] }
  0x13   :  { %v1524_v63 = vld [vmem:[%s2069_s8] ss:$0 sm:$0xff] }
  0x14   :  { %v1499_v14 = vld [vmem:[%s2082_s19] sm:$0xff]  ;;  %204 = vmatpush.bf16.msra.mxu2 %v1497_v13  ;;  %s1357_s19 = sshll.u32 %s2078_s17, 4  ;;  %s1358_s19 = int_to_ptr.hbm [resolvable:$true] %s1357_s19 }
  0x15   :  { %v1525_v3 = vld [vmem:[%s2070_s9] ss:$0 sm:$0xff] }
  0x16   :  { %173 = vmatpush.bf16.msra.mxu1 %v1501_v10  ;;  %v1545_v33 = vpop.eup %1544 }
  0x17   :  { %v228_v34 = vmul.f32 32.0, %v1545_v33  ;;  %vm232_vm4 = vweird.f32 %v1545_v33 }
  0x19   :  { %v229_v35 = vsub.f32 1.0, %v228_v34 }
  0x1a   :  { %174 = vmatpush.bf16.msra.mxu1 %v1500_v12 }
  0x1b   :  { %v230_v36 = vmul.f32 %v1545_v33, %v229_v35 }
  0x1d   :  { %1406 = vmatmul.msk.bf16.vlgmr.msra.gmra.mxu1 %vm163_vm2, %v1499_v14  ;;  %v231_v37 = vadd.f32 %v1545_v33, %v230_v36 }
  0x1f   :  { %v1766_v38 = vsel %vm232_vm4, %v1545_v33, %v231_v37  ;;  %vm380_vm4 = vcmask 130048  }
  0x8d   :  { %v98_v15 = vpop.f32.mrf.mxu0 }
  0x8e   :  { %v99_v18 = vadd.f32 %v1522_v16, %v98_v15 }
  0x95   :  { %v100_v17 = vpop.f32.mrf.mxu0 }
  0x96   :  { %v101_v19 = vadd.f32 %v1522_v16, %v100_v17 }
  0x98   :  { %v103_v20 = vpack.c.bf16 %v101_v19, %v99_v18 }
  0x9a   :  { %1415 = vmatmul.msk.bf16.vlgmr.msra.gmra.mxu2 %vm193_vm3, %v103_v20  ;;  %v176_v21 = vpop.f32.mrf.mxu1 }
  0xa2   :  { %v178_v27 = vpop.f32.mrf.mxu1 }
 0x11d   :  { %v206_v23 = vpop.f32.mrf.mxu2 }
 0x11e   :  { %v207_v24 = vadd.f32 %v206_v23, %v176_v21 }
 0x120   :  { %v1758_v25 = vadd.f32 %v1523_v22, %v207_v24 }
 0x122   :  { %v221_v26 = vsel %vm193_vm3, %v1758_v25, 0.0 }
 0x123   :  { %222 = vadd.xlane.f32.xlu0 %v221_v26 }
 0x125   :  { %v208_v28 = vpop.f32.mrf.mxu2 }
 0x126   :  { %v209_v29 = vadd.f32 %v208_v28, %v178_v27 }
 0x128   :  { %v1762_v30 = vadd.f32 %v1523_v22, %v209_v29 }
 0x12a   :  { %v224_v31 = vsel %vm193_vm3, %v1762_v30, 0.0 }
 0x12b   :  { %225 = vadd.xlane.f32.xlu0 %v224_v31 }
 0x196   :  { %v223_v39 = vpop.xlane.xlu0 %222 }
 0x197   :  { %v234_v40 = vmul.f32 %v1766_v38, %v223_v39 }
 0x199   :  { %v236_v41 = vsub.f32 %v1758_v25, %v234_v40 }
 0x19b   :  { %v238_v42 = vmul.f32 %v236_v41, %v236_v41 }
 0x19d   :  { %v240_v43 = vsel %vm193_vm3, %v238_v42, 0.0 }
 0x19e   :  { %241 = vadd.xlane.f32.xlu1 %v240_v43  ;;  %v226_v44 = vpop.xlane.xlu0 %225 }
 0x19f   :  { %v235_v45 = vmul.f32 %v1766_v38, %v226_v44 }
 0x1a1   :  { %v237_v46 = vsub.f32 %v1762_v30, %v235_v45 }
 0x1a3   :  { %v239_v47 = vmul.f32 %v237_v46, %v237_v46 }
 0x1a5   :  { %v243_v48 = vsel %vm193_vm3, %v239_v47, 0.0 }
 0x1a6   :  { %244 = vadd.xlane.f32.xlu1 %v243_v48 }
 0x211   :  { %v242_v49 = vpop.xlane.xlu1 %241 }
 0x212   :  { %v246_v50 = vmul.f32 %v242_v49, %v1766_v38 }
 0x214   :  { %v248_v51 = vadd.f32 1e-05, %v246_v50 }
 0x216   :  { %1546 = vrsqrt.f32 %v248_v51  ;;  %vm256_vm6 = vweird.f32 %v248_v51 }
 0x219   :  { %v245_v52 = vpop.xlane.xlu1 %244 }
 0x21a   :  { %v247_v53 = vmul.f32 %v245_v52, %v1766_v38 }
 0x21c   :  { %v1547_v54 = vpop.eup %1546  ;;  %v249_v55 = vadd.f32 1e-05, %v247_v53 }
 0x21d   :  { %v251_v56 = vmul.f32 %v1547_v54, %v248_v51  ;;  %vm257_vm5 = vweird.f32 %v1547_v54 }
 0x21e   :  { %1548 = vrsqrt.f32 %v249_v55  ;;  %vm258_vm7 = vmor %vm256_vm6, %vm257_vm5  ;;  %vm266_vm9 = vweird.f32 %v249_v55 }
 0x21f   :  { %v252_v57 = vmul.f32 %v1547_v54, %v251_v56 }
 0x221   :  { %v253_v58 = vmul.f32 0.5, %v252_v57 }
 0x223   :  { %v254_v59 = vsub.f32 1.5, %v253_v58 }
 0x224   :  { %v1549_v60 = vpop.eup %1548 }
 0x225   :  { %v255_v61 = vmul.f32 %v1547_v54, %v254_v59  ;;  %v261_v62 = vmul.f32 %v1549_v60, %v249_v55  ;;  %vm267_vm8 = vweird.f32 %v1549_v60 }
 0x226   :  { %vm268_vm10 = vmor %vm266_vm9, %vm267_vm8 }
 0x227   :  { %v259_v0 = vsel %vm258_vm7, %v1547_v54, %v255_v61  ;;  %v262_v1 = vmul.f32 %v1549_v60, %v261_v62 }
 0x228   :  { %v270_v2 = vmul.f32 %v259_v0, %v236_v41 }
 0x229   :  { %v263_v4 = vmul.f32 0.5, %v262_v1 }
 0x22a   :  { %v275_v5 = vmul.f32 %v1524_v63, %v270_v2 }
 0x22b   :  { %v264_v6 = vsub.f32 1.5, %v263_v4 }
 0x22c   :  { %v1782_v7 = vadd.f32 %v1525_v3, %v275_v5 }
 0x22d   :  { %v265_v8 = vmul.f32 %v1549_v60, %v264_v6 }
 0x22e   :  { %v284_v9 = vmul.f32 0.70710677, %v1782_v7 }
 0x22f   :  { %v269_v10 = vsel %vm268_vm10, %v1549_v60, %v265_v8 }
 0x230   :  { %v271_v11 = vmul.f32 %v269_v10, %v237_v46  ;;  %v286_v12 = vmul.f32 %v284_v9, %v284_v9 }
 0x232   :  { %v276_v13 = vmul.f32 %v1524_v63, %v271_v11  ;;  %v287_v14 = vmin.f32 %v286_v12, 16.0 }
 0x234   :  { %v288_v15 = vmul.f32 2.1237322e-06, %v287_v14  ;;  %v299_v16 = vmul.f32 3.8918573e-05, %v287_v14  ;;  %v1785_v17 = vadd.f32 %v1525_v3, %v276_v13 }
 0x236   :  { %v289_v18 = vadd.f32 0.00028619796, %v288_v15  ;;  %v300_v19 = vadd.f32 0.001143296, %v299_v16  ;;  %v1788_v20 = vmul.f32 0.70710677, %v1785_v17 }
 0x238   :  { %v290_v21 = vmul.f32 %v289_v18, %v287_v14  ;;  %v301_v22 = vmul.f32 %v300_v19, %v287_v14  ;;  %v326_v23 = vmul.f32 %v1788_v20, %v1788_v20 }
 0x23a   :  { %v302_v24 = vadd.f32 0.014752088, %v301_v22  ;;  %v291_v26 = vadd.f32 0.0036580483, %v290_v21  ;;  %v327_v27 = vmin.f32 %v326_v23, 16.0  ;;  %v282_v21 = vmul.f32 0.5, %v1782_v7 }
 0x23b   :  { %v283_v7 = vmul.f32 0.5, %v1785_v17 }
 0x23c   :  { %v303_v28 = vmul.f32 %v302_v24, %v287_v14  ;;  %v328_v29 = vmul.f32 2.1237322e-06, %v327_v27  ;;  %v339_v31 = vmul.f32 3.8918573e-05, %v327_v27  ;;  %v292_v33 = vmul.f32 %v291_v26, %v287_v14 }
 0x23e   :  { %v304_v32 = vadd.f32 0.112945676, %v303_v28  ;;  %v329_v34 = vadd.f32 0.00028619796, %v328_v29  ;;  %v340_v35 = vadd.f32 0.001143296, %v339_v31 }
 0x23f   :  { %v293_v41 = vadd.f32 0.05243302, %v292_v33 }
 0x240   :  { %v305_v36 = vmul.f32 %v304_v32, %v287_v14  ;;  %v330_v37 = vmul.f32 %v329_v34, %v327_v27  ;;  %v341_v39 = vmul.f32 %v340_v35, %v327_v27 }
 0x241   :  { %v294_v47 = vmul.f32 %v293_v41, %v287_v14 }
 0x242   :  { %v306_v40 = vadd.f32 0.4994258, %v305_v36  ;;  %v342_v42 = vadd.f32 0.014752088, %v341_v39  ;;  %v331_v44 = vadd.f32 0.0036580483, %v330_v37 }
 0x243   :  { %v295_v51 = vadd.f32 0.18741608, %v294_v47  ;;  %v1620_v37 = vmov 16.0  }
 0x244   :  { %v307_v43 = vmul.f32 %v306_v40, %v287_v14  ;;  %v343_v45 = vmul.f32 %v342_v42, %v327_v27  ;;  %v332_v49 = vmul.f32 %v331_v44, %v327_v27 }
 0x245   :  { %v296_v56 = vmul.f32 %v295_v51, %v287_v14 }
 0x246   :  { %v308_v46 = vadd.f32 1.0, %v307_v43  ;;  %v344_v48 = vadd.f32 0.112945676, %v343_v45  ;;  %v333_v53 = vadd.f32 0.05243302, %v332_v49 }
 0x247   :  { %v297_v62 = vadd.f32 1.1283791, %v296_v56 }
 0x248   :  { %1550 = vrcp.f32 %v308_v46  ;;  %v345_v50 = vmul.f32 %v344_v48, %v327_v27  ;;  %v334_v59 = vmul.f32 %v333_v53, %v327_v27  ;;  %v320_v61 = vand.u32 2147483648, %v308_v46 }
 0x249   :  { %v318_v0 = vand.u32 2147483647, %v308_v46  ;;  %vm314_vm12 = vweird.f32 %v308_v46  ;;  %v298_v5 = vmul.f32 %v297_v62, %v284_v9 }
 0x24a   :  { %v346_v52 = vadd.f32 0.4994258, %v345_v50  ;;  %v335_v1 = vadd.f32 0.18741608, %v334_v59  ;;  %v321_v3 = vor.u32 1.1754944e-38, %v320_v61 }
 0x24b   :  { %vm319_vm14 = vcmp.eq.f32.partialorder %v318_v0, 8.507059e+37 }
 0x24c   :  { %v347_v54 = vmul.f32 %v346_v52, %v327_v27  ;;  %v336_v10 = vmul.f32 %v335_v1, %v327_v27  ;;  %v1527_v52 = vld [vmem:[%s2072_s11] ss:$0 sm:$0xff] }
 0x24e   :  { %v1551_v55 = vpop.eup %1550  ;;  %v348_v58 = vadd.f32 1.0, %v347_v54  ;;  %v337_v16 = vadd.f32 1.1283791, %v336_v10 }
 0x24f   :  { %v310_v57 = vmul.f32 %v1551_v55, %v308_v46  ;;  %vm315_vm11 = vweird.f32 %v1551_v55 }
 0x250   :  { %1552 = vrcp.f32 %v348_v58  ;;  %vm316_vm13 = vmor %vm314_vm12, %vm315_vm11  ;;  %v360_v15 = vand.u32 2147483648, %v348_v58  ;;  %v358_v19 = vand.u32 2147483647, %v348_v58  ;;  %vm354_vm0 = vweird.f32 %v348_v58 }
 0x251   :  { %v311_v60 = vsub.f32 1.0, %v310_v57  ;;  %v338_v26 = vmul.f32 %v337_v16, %v1788_v20  ;;  %1554 = vrcp.f32 %v1620_v37 }
 0x252   :  { %v361_v9 = vor.u32 1.1754944e-38, %v360_v15  ;;  %vm359_vm2 = vcmp.eq.f32.partialorder %v358_v19, 8.507059e+37 }
 0x253   :  { %v312_v63 = vmul.f32 %v1551_v55, %v311_v60 }
 0x255   :  { %v313_v2 = vadd.f32 %v1551_v55, %v312_v63 }
 0x256   :  { %v1553_v4 = vpop.eup %1552 }
 0x257   :  { %v317_v6 = vsel %vm316_vm13, %v1551_v55, %v313_v2  ;;  %v350_v11 = vmul.f32 %v1553_v4, %v348_v58  ;;  %vm355_vm15 = vweird.f32 %v1553_v4  ;;  %v1555_v39 = vpop.eup %1554  ;;  %v1526_v55 = vld [vmem:[%s2071_s10] ss:$0 sm:$0xff] }
 0x258   :  { %v322_v8 = vsel %vm319_vm14, %v321_v3, %v317_v6  ;;  %vm356_vm1 = vmor %vm354_vm0, %vm355_vm15  ;;  %v388_v40 = vmul.f32 16.0, %v1555_v39  ;;  %vm392_vm5 = vweird.f32 %v1555_v39 }
 0x259   :  { %v323_v12 = vmul.f32 %v322_v8, %v298_v5  ;;  %v351_v13 = vsub.f32 1.0, %v350_v11 }
 0x25a   :  { %v389_v17 = vsub.f32 1.0, %v388_v40 }
 0x25b   :  { %v1416_v14 = vclamps-f32 %v323_v12, 1.0  ;;  %v352_v18 = vmul.f32 %v1553_v4, %v351_v13 }
 0x25c   :  { %v390_v41 = vmul.f32 %v1555_v39, %v389_v17 }
 0x25d   :  { %v366_v22 = vadd.f32 1.0, %v1416_v14  ;;  %v353_v23 = vadd.f32 %v1553_v4, %v352_v18 }
 0x25e   :  { %v391_v42 = vadd.f32 %v1555_v39, %v390_v41 }
 0x25f   :  { %v1793_v24 = vmul.f32 %v366_v22, %v282_v21  ;;  %v357_v27 = vsel %vm356_vm1, %v1553_v4, %v353_v23 }
 0x260   :  { %v362_v28 = vsel %vm359_vm2, %v361_v9, %v357_v27  ;;  %v1805_v43 = vsel %vm392_vm5, %v1555_v39, %v391_v42  ;;  %v1528_v39 = vld [vmem:[%s2075_s14] ss:$0 sm:$0xff] }
 0x261   :  { %374 = vrot.lane.b32.xlu2 %v1793_v24, %s1619_s23  ;;  %v363_v29 = vmul.f32 %v362_v28, %v338_v26 }
 0x263   :  { %v1417_v31 = vclamps-f32 %v363_v29, 1.0 }
 0x265   :  { %v367_v32 = vadd.f32 1.0, %v1417_v31  ;;  %v1508_v31 = vld [vmem:[%s2074_s13] sm:$0xff] }
 0x267   :  { %v1799_v33 = vmul.f32 %v367_v32, %v283_v7  ;;  %v1832_v32 = vld [vmem:[%s2063_s2] sm:$0xff]  ;;  %s1623_s2 = smov 128  }
 0x269   :  { %376 = vrot.lane.b32.xlu2 %v1799_v33, %s1619_s23 }
 0x2bb   :  { %v375_v34 = vpop.permute.xlu2 %374 }
 0x2bc   :  { %v381_v20 = vsel %vm380_vm4, %v375_v34, 0.0  ;;  %v1507_v34 = vld [vmem:[%s2073_s12] sm:$0xff] }
 0x2bd   :  { %382 = vadd.xlane.f32.xlu0 %v381_v20  ;;  %527 = vmatpush.bf16.msrb.mxu0 %v1507_v34 }
 0x2c3   :  { %v377_v35 = vpop.permute.xlu2 %376 }
 0x2c4   :  { %v384_v36 = vsel %vm380_vm4, %v377_v35, 0.0 }
 0x2c5   :  { %385 = vadd.xlane.f32.xlu1 %v384_v36 }
 0x330   :  { %v383_v44 = vpop.xlane.xlu0 %382 }
 0x331   :  { %v394_v45 = vmul.f32 %v1805_v43, %v383_v44 }
 0x333   :  { %v396_v46 = vsub.f32 %v1793_v24, %v394_v45 }
 0x335   :  { %v398_v47 = vmul.f32 %v396_v46, %v396_v46 }
 0x337   :  { %402 = vrot.lane.b32.xlu2 %v398_v47, %s1619_s23 }
 0x338   :  { %v386_v48 = vpop.xlane.xlu1 %385 }
 0x339   :  { %v395_v49 = vmul.f32 %v1805_v43, %v386_v48 }
 0x33b   :  { %v397_v50 = vsub.f32 %v1799_v33, %v395_v49 }
 0x33d   :  { %v399_v51 = vmul.f32 %v397_v50, %v397_v50 }
 0x33f   :  { %404 = vrot.lane.b32.xlu0 %v399_v51, %s1619_s23 }
 0x347   :  { %449 = vrot.lane.b32.xlu0 %v1527_v52, %s1621_s25 }
 0x391   :  { %v403_v53 = vpop.permute.xlu2 %402 }
 0x392   :  { %v408_v54 = vsel %vm380_vm4, %v403_v53, 0.0 }
 0x393   :  { %409 = vadd.xlane.f32.xlu1 %v408_v54 }
 0x3ac   :  { %442 = vrot.lane.b32.xlu1 %v1526_v55, %s1621_s25 }
 0x3b1   :  { %v405_v56 = vpop.permute.xlu0 %404 }
 0x3b2   :  { %v411_v57 = vsel %vm380_vm4, %v405_v56, 0.0 }
 0x3b3   :  { %412 = vadd.xlane.f32.xlu2 %v411_v57 }
 0x3b9   :  { %v450_v19 = vpop.permute.xlu0 %449 }
 0x406   :  { %v410_v58 = vpop.xlane.xlu1 %409 }
 0x407   :  { %v414_v59 = vmul.f32 %v410_v58, %v1805_v43 }
 0x409   :  { %v416_v60 = vadd.f32 1e-05, %v414_v59 }
 0x40b   :  { %1556 = vrsqrt.f32 %v416_v60  ;;  %vm424_vm7 = vweird.f32 %v416_v60 }
 0x411   :  { %v1557_v61 = vpop.eup %1556 }
 0x412   :  { %v419_v62 = vmul.f32 %v1557_v61, %v416_v60  ;;  %vm425_vm6 = vweird.f32 %v1557_v61 }
 0x413   :  { %vm426_vm8 = vmor %vm424_vm7, %vm425_vm6 }
 0x414   :  { %v420_v63 = vmul.f32 %v1557_v61, %v419_v62 }
 0x416   :  { %v421_v2 = vmul.f32 0.5, %v420_v63 }
 0x418   :  { %v422_v4 = vsub.f32 1.5, %v421_v2 }
 0x41a   :  { %v423_v5 = vmul.f32 %v1557_v61, %v422_v4 }
 0x41c   :  { %v427_v10 = vsel %vm426_vm8, %v1557_v61, %v423_v5  ;;  %v1510_v61 = vld [vmem:[%s2074_s13 + $0x8] sm:$0xff] }
 0x41d   :  { %v438_v13 = vmul.f32 %v427_v10, %v396_v46 }
 0x41e   :  { %v443_v14 = vpop.permute.xlu1 %442 }
 0x41f   :  { %v445_v18 = vmul.f32 %v443_v14, %v438_v13 }
 0x421   :  { %v452_v23 = vadd.f32 %v450_v19, %v445_v18 }
 0x423   :  { %v454_v27 = vmax.f32 %v452_v23, 0.0 }
 0x426   :  { %v413_v0 = vpop.xlane.xlu2 %412 }
 0x427   :  { %v415_v1 = vmul.f32 %v413_v0, %v1805_v43 }
 0x429   :  { %v417_v3 = vadd.f32 1e-05, %v415_v1 }
 0x42b   :  { %1558 = vrsqrt.f32 %v417_v3  ;;  %vm434_vm10 = vweird.f32 %v417_v3 }
 0x431   :  { %v1559_v6 = vpop.eup %1558 }
 0x432   :  { %v429_v8 = vmul.f32 %v1559_v6, %v417_v3  ;;  %vm435_vm9 = vweird.f32 %v1559_v6 }
 0x433   :  { %vm436_vm11 = vmor %vm434_vm10, %vm435_vm9 }
 0x434   :  { %v430_v11 = vmul.f32 %v1559_v6, %v429_v8 }
 0x436   :  { %v431_v12 = vmul.f32 0.5, %v430_v11 }
 0x438   :  { %v432_v15 = vsub.f32 1.5, %v431_v12 }
 0x43a   :  { %v433_v16 = vmul.f32 %v1559_v6, %v432_v15 }
 0x43c   :  { %v437_v21 = vsel %vm436_vm11, %v1559_v6, %v433_v16 }
 0x43d   :  { %v439_v22 = vmul.f32 %v437_v21, %v397_v50 }
 0x43f   :  { %v446_v9 = vmul.f32 %v443_v14, %v439_v22 }
 0x441   :  { %v453_v26 = vadd.f32 %v450_v19, %v446_v9  ;;  %v1529_v19 = vld [vmem:[%s2071_s10 + $0x1] ss:$0 sm:$0xff] }
 0x442   :  { %v1530_v9 = vld [vmem:[%s2072_s11 + $0x1] ss:$0 sm:$0xff] }
 0x443   :  { %v455_v28 = vmax.f32 %v453_v26, 0.0 }
 0x445   :  { %v456_v29 = vpack.c.bf16 %v455_v28, %v454_v27 }
 0x447   :  { %463 = vrot.lane.b32.xlu0 %v456_v29, %s1619_s23 }
 0x4b9   :  { %v464_v7 = vpop.permute.xlu0 %463 }
 0x4ba   :  { %476 = vmatpush.bf16.msra.mxu3 %v464_v7 }
 0x4bd   :  { %1422 = vmatmul.msk.bf16.vlgmr.msra.gmra.mxu3 %vm380_vm4, %v1832_v32 }
 0x4be   :  { %504 = vmatpush.bf16.msrb.mxu3 %v1508_v31 }
 0x4c2   :  { %640 = vmatpush.bf16.msra.mxu3 %v1510_v61 }
 0x4cd   :  { %1427 = vmatmul.msk.bf16.vlgmr.msrb.gmra.mxu3 %vm380_vm4, %v464_v7 }
 0x540   :  { %v478_v20 = vpop.f32.mrf.mxu3 }
 0x548   :  { %v480_v35 = vpop.f32.mrf.mxu3 }
 0x549   :  { %v483_v36 = vpack.c.bf16 %v480_v35, %v478_v20  ;;  %v1509_v35 = vld [vmem:[%s2073_s12 + $0x8] sm:$0xff] }
 0x54a   :  { %663 = vmatpush.bf16.msra.mxu0 %v1509_v35 }
 0x54b   :  { %1432 = vmatmul.msk.bf16.vlgmr.msrb.gmra.mxu0 %vm380_vm4, %v483_v36 }
 0x550   :  { %v506_v37 = vpop.f32.mrf.mxu3 }
 0x558   :  { %v508_v45 = vpop.f32.mrf.mxu3 }
 0x5c8   :  { %v529_v40 = vpop.f32.mrf.mxu0 }
 0x5c9   :  { %v530_v17 = vadd.f32 %v529_v40, %v506_v37 }
 0x5cb   :  { %v538_v41 = vadd.f32 %v1528_v39, %v530_v17  ;;  %v1531_v17 = vld [vmem:[%s2075_s14 + $0x1] ss:$0 sm:$0xff] }
 0x5cd   :  { %v1845_v42 = vadd.f32 %v538_v41, %v1793_v24 }
 0x5cf   :  { %v546_v44 = vsel %vm380_vm4, %v1845_v42, 0.0 }
 0x5d0   :  { %v531_v46 = vpop.f32.mrf.mxu0  ;;  %547 = vadd.xlane.f32.xlu1 %v546_v44 }
 0x5d1   :  { %v532_v47 = vadd.f32 %v531_v46, %v508_v45 }
 0x5d3   :  { %v539_v48 = vadd.f32 %v1528_v39, %v532_v47 }
 0x5d5   :  { %v1850_v49 = vadd.f32 %v539_v48, %v1799_v33 }
 0x5d7   :  { %v549_v50 = vsel %vm380_vm4, %v1850_v49, 0.0 }
 0x5d8   :  { %550 = vadd.xlane.f32.xlu0 %v549_v50 }
 0x643   :  { %v548_v51 = vpop.xlane.xlu1 %547 }
 0x644   :  { %v552_v52 = vmul.f32 %v548_v51, %v1805_v43 }
 0x646   :  { %v554_v53 = vsub.f32 %v1845_v42, %v552_v52 }
 0x648   :  { %v556_v54 = vmul.f32 %v554_v53, %v554_v53 }
 0x64a   :  { %v558_v55 = vsel %vm380_vm4, %v556_v54, 0.0 }
 0x64b   :  { %v551_v56 = vpop.xlane.xlu0 %550  ;;  %559 = vadd.xlane.f32.xlu2 %v558_v55 }
 0x64c   :  { %v553_v57 = vmul.f32 %v551_v56, %v1805_v43 }
 0x64e   :  { %v555_v58 = vsub.f32 %v1850_v49, %v553_v57 }
 0x650   :  { %v557_v59 = vmul.f32 %v555_v58, %v555_v58 }
 0x652   :  { %v561_v60 = vsel %vm380_vm4, %v557_v59, 0.0 }
 0x653   :  { %562 = vadd.xlane.f32.xlu2 %v561_v60 }
 0x6be   :  { %v560_v62 = vpop.xlane.xlu2 %559 }
 0x6bf   :  { %v564_v63 = vmul.f32 %v560_v62, %v1805_v43 }
 0x6c1   :  { %v566_v0 = vadd.f32 1e-05, %v564_v63 }
 0x6c3   :  { %1560 = vrsqrt.f32 %v566_v0  ;;  %vm574_vm13 = vweird.f32 %v566_v0 }
 0x6c6   :  { %v563_v1 = vpop.xlane.xlu2 %562 }
 0x6c7   :  { %v565_v2 = vmul.f32 %v563_v1, %v1805_v43 }
 0x6c9   :  { %v1561_v3 = vpop.eup %1560  ;;  %v567_v4 = vadd.f32 1e-05, %v565_v2 }
 0x6ca   :  { %v569_v5 = vmul.f32 %v1561_v3, %v566_v0  ;;  %vm575_vm12 = vweird.f32 %v1561_v3 }
 0x6cb   :  { %1562 = vrsqrt.f32 %v567_v4  ;;  %vm576_vm14 = vmor %vm574_vm13, %vm575_vm12  ;;  %vm584_vm0 = vweird.f32 %v567_v4 }
 0x6cc   :  { %v570_v6 = vmul.f32 %v1561_v3, %v569_v5 }
 0x6ce   :  { %v571_v8 = vmul.f32 0.5, %v570_v6 }
 0x6d0   :  { %v572_v10 = vsub.f32 1.5, %v571_v8 }
 0x6d1   :  { %v1563_v11 = vpop.eup %1562 }
 0x6d2   :  { %v573_v12 = vmul.f32 %v1561_v3, %v572_v10  ;;  %v579_v13 = vmul.f32 %v1563_v11, %v567_v4  ;;  %vm585_vm15 = vweird.f32 %v1563_v11 }
 0x6d3   :  { %vm586_vm1 = vmor %vm584_vm0, %vm585_vm15 }
 0x6d4   :  { %v577_v14 = vsel %vm576_vm14, %v1561_v3, %v573_v12  ;;  %v580_v15 = vmul.f32 %v1563_v11, %v579_v13  ;;  %v1532_v12 = vld [vmem:[%s2076_s15] ss:$0 sm:$0xff] }
 0x6d5   :  { %v588_v18 = vmul.f32 %v577_v14, %v554_v53 }
 0x6d6   :  { %v581_v16 = vmul.f32 0.5, %v580_v15  ;;  %v1533_v15 = vld [vmem:[%s2077_s16] ss:$0 sm:$0xff] }
 0x6d7   :  { %v593_v23 = vmul.f32 %v1529_v19, %v588_v18 }
 0x6d8   :  { %v582_v21 = vsub.f32 1.5, %v581_v16 }
 0x6d9   :  { %v598_v29 = vadd.f32 %v1530_v9, %v593_v23 }
 0x6da   :  { %v583_v22 = vmul.f32 %v1563_v11, %v582_v21 }
 0x6db   :  { %v600_v7 = vmax.f32 %v598_v29, 0.0 }
 0x6dc   :  { %v587_v26 = vsel %vm586_vm1, %v1563_v11, %v583_v22 }
 0x6dd   :  { %v589_v27 = vmul.f32 %v587_v26, %v555_v58 }
 0x6df   :  { %v594_v28 = vmul.f32 %v1529_v19, %v589_v27 }
 0x6e1   :  { %v599_v31 = vadd.f32 %v1530_v9, %v594_v28 }
 0x6e3   :  { %v601_v34 = vmax.f32 %v599_v31, 0.0 }
 0x6e5   :  { %v602_v20 = vpack.c.bf16 %v601_v34, %v600_v7 }
 0x6e7   :  { %610 = vmatpush.bf16.msrb.mxu2 %v602_v20  ;;  %1444 = vmatmul.msk.bf16.vlgmr.msra.gmra.mxu3 %vm380_vm4, %v602_v20 }
 0x6ea   :  { %1435 = vmatmul.msk.bf16.vlgmr.msrb.gmra.mxu2 %vm380_vm4, %v1832_v32 }
 0x76a   :  { %v642_v40 = vpop.f32.mrf.mxu3 }
 0x76d   :  { %v612_v36 = vpop.f32.mrf.mxu2 }
 0x772   :  { %v644_v46 = vpop.f32.mrf.mxu3 }
 0x775   :  { %v614_v37 = vpop.f32.mrf.mxu2 }
 0x776   :  { %v617_v39 = vpack.c.bf16 %v614_v37, %v612_v36 }
 0x778   :  { %1449 = vmatmul.msk.bf16.vlgmr.msra.gmra.mxu0 %vm380_vm4, %v617_v39 }
 0x7f5   :  { %v665_v41 = vpop.f32.mrf.mxu0 }
 0x7f6   :  { %v666_v44 = vadd.f32 %v665_v41, %v642_v40 }
 0x7f8   :  { %v675_v45 = vadd.f32 %v1531_v17, %v666_v44 }
 0x7fa   :  { %679 = vrot.lane.b32.xlu2 %v675_v45, %s1621_s25 }
 0x7fd   :  { %v667_v47 = vpop.f32.mrf.mxu0 }
 0x7fe   :  { %v668_v48 = vadd.f32 %v667_v47, %v644_v46 }
 0x800   :  { %v676_v50 = vadd.f32 %v1531_v17, %v668_v48 }
 0x802   :  { %681 = vrot.lane.b32.xlu1 %v676_v50, %s1621_s25 }
 0x854   :  { %v680_v51 = vpop.permute.xlu2 %679 }
 0x855   :  { %v685_v52 = vadd.f32 %v680_v51, %v1793_v24 }
 0x857   :  { %v687_v53 = vsel %vm380_vm4, %v1845_v42, %v685_v52 }
 0x858   :  { %v689_v54 = vadd.f32 %v687_v53, %v1758_v25 }
 0x85a   :  { %v693_v55 = vsel %vm193_vm3, %v689_v54, 0.0 }
 0x85b   :  { %694 = vadd.xlane.f32.xlu0 %v693_v55 }
 0x874   :  { %v682_v56 = vpop.permute.xlu1 %681 }
 0x875   :  { %v686_v57 = vadd.f32 %v682_v56, %v1799_v33 }
 0x877   :  { %v688_v58 = vsel %vm380_vm4, %v1850_v49, %v686_v57 }
 0x878   :  { %v690_v59 = vadd.f32 %v688_v58, %v1762_v30 }
 0x87a   :  { %v696_v60 = vsel %vm193_vm3, %v690_v59, 0.0 }
 0x87b   :  { %697 = vadd.xlane.f32.xlu2 %v696_v60 }
 0x8ce   :  { %v695_v24 = vpop.xlane.xlu0 %694 }
 0x8cf   :  { %v699_v61 = vmul.f32 %v695_v24, %v1766_v38 }
 0x8d1   :  { %v701_v42 = vsub.f32 %v689_v54, %v699_v61  ;;  %v1535_v61 = vld [vmem:[%s2070_s9 + $0x1] ss:$0 sm:$0xff] }
 0x8d3   :  { %v703_v62 = vmul.f32 %v701_v42, %v701_v42 }
 0x8d5   :  { %v705_v25 = vsel %vm193_vm3, %v703_v62, 0.0 }
 0x8d6   :  { %706 = vadd.xlane.f32.xlu0 %v705_v25 }
 0x8ee   :  { %v698_v63 = vpop.xlane.xlu2 %697 }
 0x8ef   :  { %v700_v0 = vmul.f32 %v698_v63, %v1766_v38 }
 0x8f1   :  { %v702_v33 = vsub.f32 %v690_v59, %v700_v0  ;;  %v1534_v59 = vld [vmem:[%s2069_s8 + $0x1] ss:$0 sm:$0xff]  ;;  %s1624_s8 = smov 8  }
 0x8f3   :  { %v704_v1 = vmul.f32 %v702_v33, %v702_v33 }
 0x8f5   :  { %v708_v49 = vsel %vm193_vm3, %v704_v1, 0.0 }
 0x8f6   :  { %709 = vadd.xlane.f32.xlu0 %v708_v49 }
 0x949   :  { %v707_v30 = vpop.xlane.xlu0 %706 }
 0x94a   :  { %v711_v2 = vmul.f32 %v707_v30, %v1766_v38 }
 0x94c   :  { %v713_v3 = vadd.f32 1e-05, %v711_v2 }
 0x94e   :  { %1564 = vrsqrt.f32 %v713_v3  ;;  %vm721_vm5 = vweird.f32 %v713_v3 }
 0x954   :  { %v1565_v4 = vpop.eup %1564 }
 0x955   :  { %v716_v5 = vmul.f32 %v1565_v4, %v713_v3  ;;  %vm722_vm2 = vweird.f32 %v1565_v4 }
 0x956   :  { %vm723_vm6 = vmor %vm721_vm5, %vm722_vm2 }
 0x957   :  { %v717_v6 = vmul.f32 %v1565_v4, %v716_v5 }
 0x959   :  { %v718_v8 = vmul.f32 0.5, %v717_v6 }
 0x95b   :  { %v719_v10 = vsub.f32 1.5, %v718_v8 }
 0x95d   :  { %v720_v11 = vmul.f32 %v1565_v4, %v719_v10 }
 0x95f   :  { %v724_v13 = vsel %vm723_vm6, %v1565_v4, %v720_v11 }
 0x960   :  { %v735_v14 = vmul.f32 %v724_v13, %v701_v42 }
 0x962   :  { %v740_v16 = vmul.f32 %v1532_v12, %v735_v14 }
 0x964   :  { %v1904_v18 = vadd.f32 %v1533_v15, %v740_v16 }
 0x966   :  { %v751_v19 = vsel %vm193_vm3, %v1904_v18, 0.0 }
 0x967   :  { %752 = vadd.xlane.f32.xlu1 %v751_v19 }
 0x969   :  { %v710_v21 = vpop.xlane.xlu0 %709 }
 0x96a   :  { %v712_v22 = vmul.f32 %v710_v21, %v1766_v38 }
 0x96c   :  { %v714_v23 = vadd.f32 1e-05, %v712_v22 }
 0x96e   :  { %1566 = vrsqrt.f32 %v714_v23  ;;  %vm731_vm8 = vweird.f32 %v714_v23 }
 0x974   :  { %v1567_v9 = vpop.eup %1566 }
 0x975   :  { %v726_v26 = vmul.f32 %v1567_v9, %v714_v23  ;;  %vm732_vm7 = vweird.f32 %v1567_v9 }
 0x976   :  { %vm733_vm9 = vmor %vm731_vm8, %vm732_vm7 }
 0x977   :  { %v727_v27 = vmul.f32 %v1567_v9, %v726_v26 }
 0x979   :  { %v728_v28 = vmul.f32 0.5, %v727_v27 }
 0x97b   :  { %v729_v29 = vsub.f32 1.5, %v728_v28 }
 0x97d   :  { %v730_v31 = vmul.f32 %v1567_v9, %v729_v29 }
 0x97f   :  { %v734_v7 = vsel %vm733_vm9, %v1567_v9, %v730_v31 }
 0x980   :  { %v736_v34 = vmul.f32 %v734_v7, %v702_v33 }
 0x982   :  { %v741_v20 = vmul.f32 %v1532_v12, %v736_v34 }
 0x984   :  { %v1909_v35 = vadd.f32 %v1533_v15, %v741_v20 }
 0x986   :  { %v754_v36 = vsel %vm193_vm3, %v1909_v35, 0.0 }
 0x987   :  { %755 = vadd.xlane.f32.xlu0 %v754_v36 }
 0x9da   :  { %v753_v37 = vpop.xlane.xlu1 %752 }
 0x9db   :  { %v757_v39 = vmul.f32 %v753_v37, %v1766_v38 }
 0x9dd   :  { %v759_v40 = vsub.f32 %v1904_v18, %v757_v39 }
 0x9df   :  { %v761_v17 = vmul.f32 %v759_v40, %v759_v40 }
 0x9e1   :  { %v763_v41 = vsel %vm193_vm3, %v761_v17, 0.0 }
 0x9e2   :  { %764 = vadd.xlane.f32.xlu0 %v763_v41 }
 0x9fa   :  { %v756_v44 = vpop.xlane.xlu0 %755 }
 0x9fb   :  { %v758_v45 = vmul.f32 %v756_v44, %v1766_v38 }
 0x9fd   :  { %v760_v46 = vsub.f32 %v1909_v35, %v758_v45 }
 0x9ff   :  { %v762_v47 = vmul.f32 %v760_v46, %v760_v46 }
 0xa01   :  { %v766_v48 = vsel %vm193_vm3, %v762_v47, 0.0 }
 0xa02   :  { %767 = vadd.xlane.f32.xlu0 %v766_v48 }
 0xa55   :  { %v765_v50 = vpop.xlane.xlu0 %764 }
 0xa56   :  { %v769_v51 = vmul.f32 %v765_v50, %v1766_v38 }
 0xa58   :  { %v771_v52 = vadd.f32 1e-05, %v769_v51 }
 0xa5a   :  { %1568 = vrsqrt.f32 %v771_v52  ;;  %vm779_vm11 = vweird.f32 %v771_v52 }
 0xa60   :  { %v1569_v53 = vpop.eup %1568 }
 0xa61   :  { %v774_v54 = vmul.f32 %v1569_v53, %v771_v52  ;;  %vm780_vm10 = vweird.f32 %v1569_v53 }
 0xa62   :  { %vm781_vm12 = vmor %vm779_vm11, %vm780_vm10 }
 0xa63   :  { %v775_v55 = vmul.f32 %v1569_v53, %v774_v54 }
 0xa65   :  { %v776_v56 = vmul.f32 0.5, %v775_v55 }
 0xa67   :  { %v777_v57 = vsub.f32 1.5, %v776_v56 }
 0xa69   :  { %v778_v58 = vmul.f32 %v1569_v53, %v777_v57 }
 0xa6b   :  { %v782_v60 = vsel %vm781_vm12, %v1569_v53, %v778_v58 }
 0xa6c   :  { %v793_v24 = vmul.f32 %v782_v60, %v759_v40 }
 0xa6e   :  { %v798_v42 = vmul.f32 %v1534_v59, %v793_v24 }
 0xa70   :  { %v1926_v62 = vadd.f32 %v1535_v61, %v798_v42 }
 0xa72   :  { %v807_v25 = vmul.f32 0.70710677, %v1926_v62 }
 0xa74   :  { %v809_v63 = vmul.f32 %v807_v25, %v807_v25 }
 0xa75   :  { %v768_v0 = vpop.xlane.xlu0 %767 }
 0xa76   :  { %v770_v33 = vmul.f32 %v768_v0, %v1766_v38  ;;  %v810_v1 = vmin.f32 %v809_v63, 16.0 }
 0xa78   :  { %v772_v49 = vadd.f32 1e-05, %v770_v33  ;;  %v811_v30 = vmul.f32 2.1237322e-06, %v810_v1  ;;  %v822_v2 = vmul.f32 3.8918573e-05, %v810_v1 }
 0xa7a   :  { %1570 = vrsqrt.f32 %v772_v49  ;;  %v812_v3 = vadd.f32 0.00028619796, %v811_v30  ;;  %v823_v4 = vadd.f32 0.001143296, %v822_v2  ;;  %vm789_vm14 = vweird.f32 %v772_v49 }
 0xa7c   :  { %v813_v5 = vmul.f32 %v812_v3, %v810_v1  ;;  %v824_v6 = vmul.f32 %v823_v4, %v810_v1 }
 0xa7e   :  { %v825_v8 = vadd.f32 0.014752088, %v824_v6  ;;  %v814_v10 = vadd.f32 0.0036580483, %v813_v5 }
 0xa80   :  { %v1571_v11 = vpop.eup %1570  ;;  %v826_v12 = vmul.f32 %v825_v8, %v810_v1  ;;  %v815_v16 = vmul.f32 %v814_v10, %v810_v1 }
 0xa81   :  { %v784_v13 = vmul.f32 %v1571_v11, %v772_v49  ;;  %vm790_vm13 = vweird.f32 %v1571_v11 }
 0xa82   :  { %v827_v14 = vadd.f32 0.112945676, %v826_v12  ;;  %v816_v9 = vadd.f32 0.05243302, %v815_v16  ;;  %vm791_vm15 = vmor %vm789_vm14, %vm790_vm13 }
 0xa83   :  { %v785_v15 = vmul.f32 %v1571_v11, %v784_v13 }
 0xa84   :  { %v828_v19 = vmul.f32 %v827_v14, %v810_v1  ;;  %v817_v31 = vmul.f32 %v816_v9, %v810_v1 }
 0xa85   :  { %v786_v21 = vmul.f32 0.5, %v785_v15 }
 0xa86   :  { %v829_v22 = vadd.f32 0.4994258, %v828_v19  ;;  %v818_v20 = vadd.f32 0.18741608, %v817_v31 }
 0xa87   :  { %v787_v23 = vsub.f32 1.5, %v786_v21 }
 0xa88   :  { %v830_v26 = vmul.f32 %v829_v22, %v810_v1  ;;  %v819_v40 = vmul.f32 %v818_v20, %v810_v1  ;;  %v805_v1 = vmul.f32 0.5, %v1926_v62 }
 0xa89   :  { %v788_v27 = vmul.f32 %v1571_v11, %v787_v23 }
 0xa8a   :  { %v831_v28 = vadd.f32 1.0, %v830_v26  ;;  %v820_v48 = vadd.f32 1.1283791, %v819_v40 }
 0xa8b   :  { %v792_v29 = vsel %vm791_vm15, %v1571_v11, %v788_v27 }
 0xa8c   :  { %v794_v7 = vmul.f32 %v792_v29, %v760_v46  ;;  %1572 = vrcp.f32 %v831_v28  ;;  %v843_v45 = vand.u32 2147483648, %v831_v28  ;;  %v841_v51 = vand.u32 2147483647, %v831_v28 }
 0xa8d   :  { %vm837_vm1 = vweird.f32 %v831_v28  ;;  %v821_v57 = vmul.f32 %v820_v48, %v807_v25 }
 0xa8e   :  { %v799_v34 = vmul.f32 %v1534_v59, %v794_v7  ;;  %v844_v54 = vor.u32 1.1754944e-38, %v843_v45  ;;  %vm842_vm5 = vcmp.eq.f32.partialorder %v841_v51, 8.507059e+37  ;;  %v1536_v51 = vld [vmem:[%s2071_s10 + $0x2] ss:$0 sm:$0xff] }
 0xa90   :  { %v1930_v36 = vadd.f32 %v1535_v61, %v799_v34 }
 0xa92   :  { %v1573_v37 = vpop.eup %1572  ;;  %v808_v39 = vmul.f32 0.70710677, %v1930_v36  ;;  %v806_v31 = vmul.f32 0.5, %v1930_v36 }
 0xa93   :  { %v833_v17 = vmul.f32 %v1573_v37, %v831_v28  ;;  %vm838_vm0 = vweird.f32 %v1573_v37 }
 0xa94   :  { %v849_v41 = vmul.f32 %v808_v39, %v808_v39  ;;  %vm839_vm2 = vmor %vm837_vm1, %vm838_vm0 }
 0xa95   :  { %v834_v44 = vsub.f32 1.0, %v833_v17 }
 0xa96   :  { %v850_v47 = vmin.f32 %v849_v41, 16.0 }
 0xa97   :  { %v835_v50 = vmul.f32 %v1573_v37, %v834_v44 }
 0xa98   :  { %v851_v52 = vmul.f32 2.1237322e-06, %v850_v47  ;;  %v862_v46 = vmul.f32 3.8918573e-05, %v850_v47 }
 0xa99   :  { %v836_v53 = vadd.f32 %v1573_v37, %v835_v50 }
 0xa9a   :  { %v852_v55 = vadd.f32 0.00028619796, %v851_v52  ;;  %v863_v56 = vadd.f32 0.001143296, %v862_v46 }
 0xa9b   :  { %v840_v58 = vsel %vm839_vm2, %v1573_v37, %v836_v53  ;;  %v1537_v53 = vld [vmem:[%s2072_s11 + $0x2] ss:$0 sm:$0xff] }
 0xa9c   :  { %v845_v59 = vsel %vm842_vm5, %v844_v54, %v840_v58  ;;  %v853_v60 = vmul.f32 %v852_v55, %v850_v47  ;;  %v864_v24 = vmul.f32 %v863_v56, %v850_v47 }
 0xa9d   :  { %v846_v61 = vmul.f32 %v845_v59, %v821_v57 }
 0xa9e   :  { %v865_v42 = vadd.f32 0.014752088, %v864_v24  ;;  %v854_v0 = vadd.f32 0.0036580483, %v853_v60 }
 0xa9f   :  { %v1453_v63 = vclamps-f32 %v846_v61, 1.0 }
 0xaa0   :  { %v866_v33 = vmul.f32 %v865_v42, %v850_v47  ;;  %v855_v3 = vmul.f32 %v854_v0, %v850_v47 }
 0xaa1   :  { %v889_v49 = vadd.f32 1.0, %v1453_v63  ;;  %v1512_v63 = vld [vmem:[%s2074_s13 + $0x10] sm:$0xff] }
 0xaa2   :  { %v867_v30 = vadd.f32 0.112945676, %v866_v33  ;;  %v856_v5 = vadd.f32 0.05243302, %v855_v3  ;;  %1015 = vmatpush.bf16.msra.mxu2 %v1512_v63 }
 0xaa3   :  { %v1934_v2 = vmul.f32 %v889_v49, %v805_v1 }
 0xaa4   :  { %v868_v4 = vmul.f32 %v867_v30, %v850_v47  ;;  %v857_v10 = vmul.f32 %v856_v5, %v850_v47 }
 0xaa5   :  { %899 = vrot.lane.b32.xlu2 %v1934_v2, %s1619_s23 }
 0xaa6   :  { %v869_v25 = vadd.f32 0.4994258, %v868_v4  ;;  %v858_v11 = vadd.f32 0.18741608, %v857_v10 }
 0xaa8   :  { %v870_v6 = vmul.f32 %v869_v25, %v850_v47  ;;  %v859_v13 = vmul.f32 %v858_v11, %v850_v47 }
 0xaaa   :  { %v871_v8 = vadd.f32 1.0, %v870_v6  ;;  %v860_v16 = vadd.f32 1.1283791, %v859_v13 }
 0xaac   :  { %1574 = vrcp.f32 %v871_v8  ;;  %v883_v15 = vand.u32 2147483648, %v871_v8  ;;  %v881_v21 = vand.u32 2147483647, %v871_v8  ;;  %vm877_vm7 = vweird.f32 %v871_v8 }
 0xaad   :  { %v861_v9 = vmul.f32 %v860_v16, %v808_v39 }
 0xaae   :  { %v884_v23 = vor.u32 1.1754944e-38, %v883_v15  ;;  %vm882_vm9 = vcmp.eq.f32.partialorder %v881_v21, 8.507059e+37 }
 0xab2   :  { %v1575_v12 = vpop.eup %1574 }
 0xab3   :  { %v873_v14 = vmul.f32 %v1575_v12, %v871_v8  ;;  %vm878_vm6 = vweird.f32 %v1575_v12 }
 0xab4   :  { %vm879_vm8 = vmor %vm877_vm7, %vm878_vm6 }
 0xab5   :  { %v874_v62 = vsub.f32 1.0, %v873_v14 }
 0xab7   :  { %v875_v19 = vmul.f32 %v1575_v12, %v874_v62 }
 0xab9   :  { %v876_v22 = vadd.f32 %v1575_v12, %v875_v19 }
 0xabb   :  { %v880_v26 = vsel %vm879_vm8, %v1575_v12, %v876_v22 }
 0xabc   :  { %v885_v27 = vsel %vm882_vm9, %v884_v23, %v880_v26  ;;  %v1511_v26 = vld [vmem:[%s2073_s12 + $0x10] sm:$0xff] }
 0xabd   :  { %v886_v28 = vmul.f32 %v885_v27, %v861_v9  ;;  %1038 = vmatpush.bf16.msrb.mxu3 %v1511_v26 }
 0xabf   :  { %v1454_v29 = vclamps-f32 %v886_v28, 1.0 }
 0xac1   :  { %v890_v7 = vadd.f32 1.0, %v1454_v29 }
 0xac3   :  { %v1939_v34 = vmul.f32 %v890_v7, %v806_v31  ;;  %v1538_v7 = vld [vmem:[%s2075_s14 + $0x2] ss:$0 sm:$0xff] }
 0xac5   :  { %901 = vrot.lane.b32.xlu0 %v1939_v34, %s1619_s23 }
 0xaff   :  { %v900_v20 = vpop.permute.xlu2 %899 }
 0xb00   :  { %v905_v37 = vsel %vm380_vm4, %v900_v20, 0.0 }
 0xb01   :  { %906 = vadd.xlane.f32.xlu1 %v905_v37 }
 0xb37   :  { %v902_v40 = vpop.permute.xlu0 %901 }
 0xb38   :  { %v908_v39 = vsel %vm380_vm4, %v902_v40, 0.0 }
 0xb39   :  { %909 = vadd.xlane.f32.xlu0 %v908_v39 }
 0xb4d   :  { %959 = vrot.lane.b32.xlu0 %v1536_v51, %s1621_s25 }
 0xb74   :  { %v907_v17 = vpop.xlane.xlu1 %906 }
 0xb75   :  { %v911_v41 = vmul.f32 %v907_v17, %v1805_v43 }
 0xb77   :  { %v913_v44 = vsub.f32 %v1934_v2, %v911_v41 }
 0xb79   :  { %v915_v36 = vmul.f32 %v913_v44, %v913_v44 }
 0xb7b   :  { %919 = vrot.lane.b32.xlu2 %v915_v36, %s1619_s23 }
 0xbac   :  { %v910_v45 = vpop.xlane.xlu0 %909 }
 0xbad   :  { %v912_v47 = vmul.f32 %v910_v45, %v1805_v43 }
 0xbaf   :  { %v914_v48 = vsub.f32 %v1939_v34, %v912_v47 }
 0xbb1   :  { %v916_v50 = vmul.f32 %v914_v48, %v914_v48 }
 0xbb3   :  { %921 = vrot.lane.b32.xlu1 %v916_v50, %s1619_s23 }
 0xbbf   :  { %v960_v8 = vpop.permute.xlu0 %959 }
 0xbd5   :  { %v920_v52 = vpop.permute.xlu2 %919 }
 0xbd6   :  { %v925_v46 = vsel %vm380_vm4, %v920_v52, 0.0 }
 0xbd7   :  { %926 = vadd.xlane.f32.xlu2 %v925_v46 }
 0xbef   :  { %966 = vrot.lane.b32.xlu2 %v1537_v53, %s1621_s25 }
 0xc25   :  { %v922_v54 = vpop.permute.xlu1 %921 }
 0xc26   :  { %v928_v55 = vsel %vm380_vm4, %v922_v54, 0.0 }
 0xc27   :  { %929 = vadd.xlane.f32.xlu1 %v928_v55 }
 0xc4a   :  { %v927_v56 = vpop.xlane.xlu2 %926 }
 0xc4b   :  { %v931_v57 = vmul.f32 %v927_v56, %v1805_v43 }
 0xc4d   :  { %v933_v58 = vadd.f32 1e-05, %v931_v57 }
 0xc4f   :  { %1576 = vrsqrt.f32 %v933_v58  ;;  %vm941_vm11 = vweird.f32 %v933_v58 }
 0xc52   :  { %v967_v13 = vpop.permute.xlu2 %966 }
 0xc55   :  { %v1577_v59 = vpop.eup %1576 }
 0xc56   :  { %v936_v60 = vmul.f32 %v1577_v59, %v933_v58  ;;  %vm942_vm10 = vweird.f32 %v1577_v59 }
 0xc57   :  { %vm943_vm12 = vmor %vm941_vm11, %vm942_vm10 }
 0xc58   :  { %v937_v24 = vmul.f32 %v1577_v59, %v936_v60 }
 0xc5a   :  { %v938_v0 = vmul.f32 0.5, %v937_v24  ;;  %v1514_v24 = vld [vmem:[%s2074_s13 + $0x18] sm:$0xff] }
 0xc5c   :  { %v939_v1 = vsub.f32 1.5, %v938_v0 }
 0xc5e   :  { %v940_v49 = vmul.f32 %v1577_v59, %v939_v1 }
 0xc60   :  { %v944_v4 = vsel %vm943_vm12, %v1577_v59, %v940_v49 }
 0xc61   :  { %v955_v6 = vmul.f32 %v944_v4, %v913_v44 }
 0xc63   :  { %v962_v12 = vmul.f32 %v960_v8, %v955_v6 }
 0xc65   :  { %v969_v15 = vadd.f32 %v967_v13, %v962_v12 }
 0xc67   :  { %v971_v21 = vmax.f32 %v969_v15, 0.0 }
 0xc9a   :  { %v930_v61 = vpop.xlane.xlu1 %929 }
 0xc9b   :  { %v932_v42 = vmul.f32 %v930_v61, %v1805_v43 }
 0xc9d   :  { %v934_v33 = vadd.f32 1e-05, %v932_v42 }
 0xc9f   :  { %1578 = vrsqrt.f32 %v934_v33  ;;  %vm951_vm14 = vweird.f32 %v934_v33 }
 0xca5   :  { %v1579_v30 = vpop.eup %1578 }
 0xca6   :  { %v946_v3 = vmul.f32 %v1579_v30, %v934_v33  ;;  %vm952_vm13 = vweird.f32 %v1579_v30 }
 0xca7   :  { %vm953_vm15 = vmor %vm951_vm14, %vm952_vm13 }
 0xca8   :  { %v947_v25 = vmul.f32 %v1579_v30, %v946_v3 }
 0xcaa   :  { %v948_v5 = vmul.f32 0.5, %v947_v25 }
 0xcac   :  { %v949_v10 = vsub.f32 1.5, %v948_v5 }
 0xcae   :  { %v950_v11 = vmul.f32 %v1579_v30, %v949_v10 }
 0xcb0   :  { %v954_v14 = vsel %vm953_vm15, %v1579_v30, %v950_v11 }
 0xcb1   :  { %v956_v62 = vmul.f32 %v954_v14, %v914_v48 }
 0xcb3   :  { %v963_v16 = vmul.f32 %v960_v8, %v956_v62  ;;  %v1540_v62 = vld [vmem:[%s2072_s11 + $0x3] ss:$0 sm:$0xff] }
 0xcb5   :  { %v970_v19 = vadd.f32 %v967_v13, %v963_v16 }
 0xcb7   :  { %v972_v22 = vmax.f32 %v970_v19, 0.0 }
 0xcb9   :  { %v973_v23 = vpack.c.bf16 %v972_v22, %v971_v21 }
 0xcbb   :  { %975 = vrot.lane.b32.xlu0 %v973_v23, %s1619_s23 }
 0xd2d   :  { %v976_v9 = vpop.permute.xlu0 %975 }
 0xd2e   :  { %985 = vmatpush.bf16.msrb.mxu1 %v976_v9  ;;  %1466 = vmatmul.msk.bf16.vlgmr.msra.gmra.mxu2 %vm380_vm4, %v976_v9 }
 0xd31   :  { %1457 = vmatmul.msk.bf16.vlgmr.msrb.gmra.mxu1 %vm380_vm4, %v1832_v32 }
 0xd32   :  { %1152 = vmatpush.bf16.msra.mxu1 %v1514_v24 }
 0xdae   :  { %v987_v27 = vpop.f32.mrf.mxu1 }
 0xdb1   :  { %v1017_v31 = vpop.f32.mrf.mxu2 }
 0xdb6   :  { %v989_v28 = vpop.f32.mrf.mxu1 }
 0xdb7   :  { %v992_v29 = vpack.c.bf16 %v989_v28, %v987_v27  ;;  %v1513_v27 = vld [vmem:[%s2073_s12 + $0x18] sm:$0xff] }
 0xdb8   :  { %1175 = vmatpush.bf16.msrb.mxu2 %v1513_v27 }
 0xdb9   :  { %1471 = vmatmul.msk.bf16.vlgmr.msrb.gmra.mxu3 %vm380_vm4, %v992_v29  ;;  %v1019_v41 = vpop.f32.mrf.mxu2 }
 0xe3c   :  { %v1040_v20 = vpop.f32.mrf.mxu3 }
 0xe3d   :  { %v1041_v37 = vadd.f32 %v1040_v20, %v1017_v31  ;;  %v1541_v20 = vld [vmem:[%s2075_s14 + $0x3] ss:$0 sm:$0xff] }
 0xe3f   :  { %v1050_v40 = vadd.f32 %v1538_v7, %v1041_v37 }
 0xe41   :  { %v1978_v39 = vadd.f32 %v1050_v40, %v1934_v2 }
 0xe43   :  { %v1058_v17 = vsel %vm380_vm4, %v1978_v39, 0.0 }
 0xe44   :  { %v1042_v44 = vpop.f32.mrf.mxu3  ;;  %1059 = vadd.xlane.f32.xlu0 %v1058_v17 }
 0xe45   :  { %v1043_v36 = vadd.f32 %v1042_v44, %v1019_v41 }
 0xe47   :  { %v1051_v45 = vadd.f32 %v1538_v7, %v1043_v36 }
 0xe49   :  { %v1983_v47 = vadd.f32 %v1051_v45, %v1939_v34 }
 0xe4b   :  { %v1061_v48 = vsel %vm380_vm4, %v1983_v47, 0.0 }
 0xe4c   :  { %1062 = vadd.xlane.f32.xlu1 %v1061_v48 }
 0xeb7   :  { %v1060_v50 = vpop.xlane.xlu0 %1059 }
 0xeb8   :  { %v1064_v51 = vmul.f32 %v1060_v50, %v1805_v43 }
 0xeba   :  { %v1066_v52 = vsub.f32 %v1978_v39, %v1064_v51 }
 0xebc   :  { %v1068_v46 = vmul.f32 %v1066_v52, %v1066_v52 }
 0xebe   :  { %v1070_v53 = vsel %vm380_vm4, %v1068_v46, 0.0 }
 0xebf   :  { %v1063_v54 = vpop.xlane.xlu1 %1062  ;;  %1071 = vadd.xlane.f32.xlu2 %v1070_v53 }
 0xec0   :  { %v1065_v55 = vmul.f32 %v1063_v54, %v1805_v43 }
 0xec2   :  { %v1067_v56 = vsub.f32 %v1983_v47, %v1065_v55 }
 0xec4   :  { %v1069_v57 = vmul.f32 %v1067_v56, %v1067_v56 }
 0xec6   :  { %v1073_v58 = vsel %vm380_vm4, %v1069_v57, 0.0 }
 0xec7   :  { %1074 = vadd.xlane.f32.xlu1 %v1073_v58 }
 0xf32   :  { %v1072_v59 = vpop.xlane.xlu2 %1071 }
 0xf33   :  { %v1076_v60 = vmul.f32 %v1072_v59, %v1805_v43 }
 0xf35   :  { %v1078_v61 = vadd.f32 1e-05, %v1076_v60 }
 0xf37   :  { %1580 = vrsqrt.f32 %v1078_v61  ;;  %vm1086_vm1 = vweird.f32 %v1078_v61 }
 0xf3a   :  { %v1075_v42 = vpop.xlane.xlu1 %1074 }
 0xf3b   :  { %v1077_v63 = vmul.f32 %v1075_v42, %v1805_v43  ;;  %v1539_v43 = vld [vmem:[%s2071_s10 + $0x3] ss:$0 sm:$0xff] }
 0xf3d   :  { %v1581_v0 = vpop.eup %1580  ;;  %v1079_v33 = vadd.f32 1e-05, %v1077_v63 }
 0xf3e   :  { %v1081_v1 = vmul.f32 %v1581_v0, %v1078_v61  ;;  %vm1087_vm0 = vweird.f32 %v1581_v0 }
 0xf3f   :  { %1582 = vrsqrt.f32 %v1079_v33  ;;  %vm1088_vm2 = vmor %vm1086_vm1, %vm1087_vm0  ;;  %vm1096_vm6 = vweird.f32 %v1079_v33 }
 0xf40   :  { %v1082_v49 = vmul.f32 %v1581_v0, %v1081_v1 }
 0xf42   :  { %v1083_v30 = vmul.f32 0.5, %v1082_v49 }
 0xf44   :  { %v1084_v3 = vsub.f32 1.5, %v1083_v30 }
 0xf45   :  { %v1583_v4 = vpop.eup %1582 }
 0xf46   :  { %v1085_v25 = vmul.f32 %v1581_v0, %v1084_v3  ;;  %v1091_v5 = vmul.f32 %v1583_v4, %v1079_v33  ;;  %vm1097_vm5 = vweird.f32 %v1583_v4 }
 0xf47   :  { %vm1098_vm7 = vmor %vm1096_vm6, %vm1097_vm5 }
 0xf48   :  { %v1089_v6 = vsel %vm1088_vm2, %v1581_v0, %v1085_v25  ;;  %v1092_v8 = vmul.f32 %v1583_v4, %v1091_v5 }
 0xf49   :  { %v1100_v11 = vmul.f32 %v1089_v6, %v1066_v52 }
 0xf4a   :  { %v1093_v10 = vmul.f32 0.5, %v1092_v8  ;;  %v1542_v8 = vld [vmem:[%s2076_s15 + $0x1] ss:$0 sm:$0xff]  ;;  %s1622_s15 = smov [#allocation2]  }
 0xf4b   :  { %v1105_v14 = vmul.f32 %v1539_v43, %v1100_v11 }
 0xf4c   :  { %v1094_v12 = vsub.f32 1.5, %v1093_v10 }
 0xf4d   :  { %v1110_v21 = vadd.f32 %v1540_v62, %v1105_v14 }
 0xf4e   :  { %v1095_v13 = vmul.f32 %v1583_v4, %v1094_v12 }
 0xf4f   :  { %v1112_v23 = vmax.f32 %v1110_v21, 0.0 }
 0xf50   :  { %v1099_v15 = vsel %vm1098_vm7, %v1583_v4, %v1095_v13 }
 0xf51   :  { %v1101_v16 = vmul.f32 %v1099_v15, %v1067_v56 }
 0xf53   :  { %v1106_v19 = vmul.f32 %v1539_v43, %v1101_v16 }
 0xf55   :  { %v1111_v22 = vadd.f32 %v1540_v62, %v1106_v19 }
 0xf57   :  { %v1113_v9 = vmax.f32 %v1111_v22, 0.0 }
 0xf59   :  { %v1114_v26 = vpack.c.bf16 %v1113_v9, %v1112_v23 }
 0xf5b   :  { %1122 = vmatpush.bf16.msrb.mxu0 %v1114_v26  ;;  %1484 = vmatmul.msk.bf16.vlgmr.msra.gmra.mxu1 %vm380_vm4, %v1114_v26 }
 0xf5e   :  { %1475 = vmatmul.msk.bf16.vlgmr.msrb.gmra.mxu0 %vm380_vm4, %v1832_v32 }
 0xfd8   :  { %v1154_v7 = vpop.f32.mrf.mxu1 }
 0xfdb   :  { %v1124_v28 = vpop.f32.mrf.mxu0 }
 0xfe0   :  { %v1156_v32 = vpop.f32.mrf.mxu1 }
 0xfe3   :  { %v1126_v29 = vpop.f32.mrf.mxu0 }
 0xfe4   :  { %v1129_v31 = vpack.c.bf16 %v1126_v29, %v1124_v28 }
 0xfe6   :  { %1489 = vmatmul.msk.bf16.vlgmr.msrb.gmra.mxu2 %vm380_vm4, %v1129_v31 }
0x1069   :  { %v1177_v37 = vpop.f32.mrf.mxu2 }
0x106a   :  { %v1178_v40 = vadd.f32 %v1177_v37, %v1154_v7 }
0x106c   :  { %v1187_v17 = vadd.f32 %v1541_v20, %v1178_v40 }
0x106e   :  { %1191 = vrot.lane.b32.xlu1 %v1187_v17, %s1621_s25 }
0x1071   :  { %v1179_v41 = vpop.f32.mrf.mxu2 }
0x1072   :  { %v1180_v44 = vadd.f32 %v1179_v41, %v1156_v32 }
0x1074   :  { %v1188_v36 = vadd.f32 %v1541_v20, %v1180_v44 }
0x1076   :  { %1193 = vrot.lane.b32.xlu0 %v1188_v36, %s1621_s25 }
0x10e0   :  { %v1192_v45 = vpop.permute.xlu1 %1191 }
0x10e1   :  { %v1197_v48 = vadd.f32 %v1192_v45, %v1934_v2 }
0x10e3   :  { %v1199_v50 = vsel %vm380_vm4, %v1978_v39, %v1197_v48 }
0x10e4   :  { %v1201_v51 = vadd.f32 %v1199_v50, %v1904_v18 }
0x10e6   :  { %v1207_v52 = vsel %vm193_vm3, %v1201_v51, 0.0 }
0x10e7   :  { %1208 = vadd.xlane.f32.xlu1 %v1207_v52 }
0x10e8   :  { %v1194_v46 = vpop.permute.xlu0 %1193 }
0x10e9   :  { %v1198_v53 = vadd.f32 %v1194_v46, %v1939_v34 }
0x10eb   :  { %v1200_v54 = vsel %vm380_vm4, %v1983_v47, %v1198_v53 }
0x10ec   :  { %v1202_v55 = vadd.f32 %v1200_v54, %v1909_v35 }
0x10ee   :  { %v1210_v56 = vsel %vm193_vm3, %v1202_v55, 0.0 }
0x10ef   :  { %1211 = vadd.xlane.f32.xlu2 %v1210_v56 }
0x115a   :  { %v1209_v2 = vpop.xlane.xlu1 %1208 }
0x115b   :  { %v1213_v57 = vmul.f32 %v1209_v2, %v1766_v38 }
0x115d   :  { %v1215_v39 = vsub.f32 %v1201_v51, %v1213_v57 }
0x115f   :  { %v1217_v58 = vmul.f32 %v1215_v39, %v1215_v39 }
0x1161   :  { %v1219_v18 = vsel %vm193_vm3, %v1217_v58, 0.0 }
0x1162   :  { %v1212_v59 = vpop.xlane.xlu2 %1211  ;;  %1220 = vadd.xlane.f32.xlu2 %v1219_v18 }
0x1163   :  { %v1214_v60 = vmul.f32 %v1212_v59, %v1766_v38 }
0x1165   :  { %v1216_v34 = vsub.f32 %v1202_v55, %v1214_v60 }
0x1167   :  { %v1218_v24 = vmul.f32 %v1216_v34, %v1216_v34 }
0x1169   :  { %v1222_v47 = vsel %vm193_vm3, %v1218_v24, 0.0 }
0x116a   :  { %1223 = vadd.xlane.f32.xlu2 %v1222_v47 }
0x11d5   :  { %v1221_v35 = vpop.xlane.xlu2 %1220 }
0x11d6   :  { %v1225_v61 = vmul.f32 %v1221_v35, %v1766_v38 }
0x11d8   :  { %v1227_v42 = vadd.f32 1e-05, %v1225_v61 }
0x11da   :  { %1584 = vrsqrt.f32 %v1227_v42  ;;  %vm1235_vm8 = vweird.f32 %v1227_v42 }
0x11dd   :  { %v1224_v63 = vpop.xlane.xlu2 %1223 }
0x11de   :  { %v1226_v0 = vmul.f32 %v1224_v63, %v1766_v38  ;;  %v1543_v38 = vld [vmem:[%s2077_s16 + $0x1] ss:$0 sm:$0xff]  ;;  %s1355_s16 = sshll.u32 %s1622_s15, 4  ;;  %s1356_s16 = int_to_ptr.vmem [resolvable:$true] %s1355_s16 }
0x11e0   :  { %v1585_v33 = vpop.eup %1584  ;;  %v1228_v1 = vadd.f32 1e-05, %v1226_v0 }
0x11e1   :  { %v1230_v49 = vmul.f32 %v1585_v33, %v1227_v42  ;;  %vm1236_vm4 = vweird.f32 %v1585_v33 }
0x11e2   :  { %1586 = vrsqrt.f32 %v1228_v1  ;;  %vm1237_vm9 = vmor %vm1235_vm8, %vm1236_vm4  ;;  %vm1245_vm11 = vweird.f32 %v1228_v1 }
0x11e3   :  { %v1231_v30 = vmul.f32 %v1585_v33, %v1230_v49 }
0x11e5   :  { %v1232_v3 = vmul.f32 0.5, %v1231_v30 }
0x11e7   :  { %v1233_v4 = vsub.f32 1.5, %v1232_v3 }
0x11e8   :  { %v1587_v25 = vpop.eup %1586 }
0x11e9   :  { %v1234_v5 = vmul.f32 %v1585_v33, %v1233_v4  ;;  %v1240_v6 = vmul.f32 %v1587_v25, %v1228_v1  ;;  %vm1246_vm10 = vweird.f32 %v1587_v25 }
0x11ea   :  { %vm1247_vm12 = vmor %vm1245_vm11, %vm1246_vm10 }
0x11eb   :  { %v1238_v10 = vsel %vm1237_vm9, %v1585_v33, %v1234_v5  ;;  %v1241_v43 = vmul.f32 %v1587_v25, %v1240_v6 }
0x11ec   :  { %v1249_v11 = vmul.f32 %v1238_v10, %v1215_v39 }
0x11ed   :  { %v1242_v12 = vmul.f32 0.5, %v1241_v43 }
0x11ee   :  { %v1254_v13 = vmul.f32 %v1542_v8, %v1249_v11 }
0x11ef   :  { %v1243_v14 = vsub.f32 1.5, %v1242_v12 }
0x11f0   :  { %v2038_v62 = vadd.f32 %v1543_v38, %v1254_v13 }
0x11f1   :  { %v1244_v15 = vmul.f32 %v1587_v25, %v1243_v14 }
0x11f2   :  { %v2041_v16 = vmul.f32 0.70710677, %v2038_v62 }
0x11f3   :  { %v1248_v19 = vsel %vm1247_vm12, %v1587_v25, %v1244_v15 }
0x11f4   :  { %v1265_v21 = vmul.f32 %v2041_v16, %v2041_v16  ;;  %v1250_v22 = vmul.f32 %v1248_v19, %v1216_v34 }
0x11f6   :  { %v1266_v23 = vmin.f32 %v1265_v21, 16.0  ;;  %v1255_v9 = vmul.f32 %v1542_v8, %v1250_v22 }
0x11f8   :  { %v1267_v26 = vmul.f32 2.1237322e-06, %v1266_v23  ;;  %v2045_v27 = vadd.f32 %v1543_v38, %v1255_v9  ;;  %v1278_v28 = vmul.f32 3.8918573e-05, %v1266_v23 }
0x11fa   :  { %v1268_v29 = vadd.f32 0.00028619796, %v1267_v26  ;;  %v2048_v31 = vmul.f32 0.70710677, %v2045_v27  ;;  %v1279_v7 = vadd.f32 0.001143296, %v1278_v28 }
0x11fc   :  { %v1269_v20 = vmul.f32 %v1268_v29, %v1266_v23  ;;  %v1305_v37 = vmul.f32 %v2048_v31, %v2048_v31  ;;  %v1280_v40 = vmul.f32 %v1279_v7, %v1266_v23  ;;  %v1261_v29 = vmul.f32 0.5, %v2038_v62 }
0x11fd   :  { %v1262_v62 = vmul.f32 0.5, %v2045_v27 }
0x11fe   :  { %v1306_v17 = vmin.f32 %v1305_v37, 16.0  ;;  %v1281_v32 = vadd.f32 0.014752088, %v1280_v40  ;;  %v1270_v41 = vadd.f32 0.0036580483, %v1269_v20 }
0x1200   :  { %v1307_v44 = vmul.f32 2.1237322e-06, %v1306_v17  ;;  %v1318_v36 = vmul.f32 3.8918573e-05, %v1306_v17  ;;  %v1282_v45 = vmul.f32 %v1281_v32, %v1266_v23  ;;  %v1271_v52 = vmul.f32 %v1270_v41, %v1266_v23 }
0x1202   :  { %v1308_v48 = vadd.f32 0.00028619796, %v1307_v44  ;;  %v1319_v50 = vadd.f32 0.001143296, %v1318_v36  ;;  %v1283_v51 = vadd.f32 0.112945676, %v1282_v45 }
0x1203   :  { %v1272_v57 = vadd.f32 0.05243302, %v1271_v52 }
0x1204   :  { %v1309_v46 = vmul.f32 %v1308_v48, %v1306_v17  ;;  %v1320_v53 = vmul.f32 %v1319_v50, %v1306_v17  ;;  %v1284_v54 = vmul.f32 %v1283_v51, %v1266_v23 }
0x1205   :  { %v1273_v34 = vmul.f32 %v1272_v57, %v1266_v23 }
0x1206   :  { %v1321_v55 = vadd.f32 0.014752088, %v1320_v53  ;;  %v1310_v56 = vadd.f32 0.0036580483, %v1309_v46  ;;  %v1285_v2 = vadd.f32 0.4994258, %v1284_v54 }
0x1207   :  { %v1274_v61 = vadd.f32 0.18741608, %v1273_v34 }
0x1208   :  { %v1322_v39 = vmul.f32 %v1321_v55, %v1306_v17  ;;  %v1286_v58 = vmul.f32 %v1285_v2, %v1266_v23  ;;  %v1311_v59 = vmul.f32 %v1310_v56, %v1306_v17 }
0x1209   :  { %v1275_v1 = vmul.f32 %v1274_v61, %v1266_v23 }
0x120a   :  { %v1323_v18 = vadd.f32 0.112945676, %v1322_v39  ;;  %v1287_v60 = vadd.f32 1.0, %v1286_v58  ;;  %v1312_v35 = vadd.f32 0.05243302, %v1311_v59 }
0x120b   :  { %v1276_v25 = vadd.f32 1.1283791, %v1275_v1 }
0x120c   :  { %v1324_v24 = vmul.f32 %v1323_v18, %v1306_v17  ;;  %1588 = vrcp.f32 %v1287_v60  ;;  %v1313_v33 = vmul.f32 %v1312_v35, %v1306_v17  ;;  %v1299_v4 = vand.u32 2147483648, %v1287_v60 }
0x120d   :  { %v1297_v6 = vand.u32 2147483647, %v1287_v60  ;;  %vm1293_vm14 = vweird.f32 %v1287_v60  ;;  %v1277_v12 = vmul.f32 %v1276_v25, %v2041_v16 }
0x120e   :  { %v1325_v47 = vadd.f32 0.4994258, %v1324_v24  ;;  %v1314_v3 = vadd.f32 0.18741608, %v1313_v33  ;;  %v1300_v38 = vor.u32 1.1754944e-38, %v1299_v4 }
0x120f   :  { %vm1298_vm0 = vcmp.eq.f32.partialorder %v1297_v6, 8.507059e+37 }
0x1210   :  { %v1326_v42 = vmul.f32 %v1325_v47, %v1306_v17  ;;  %v1315_v43 = vmul.f32 %v1314_v3, %v1306_v17 }
0x1212   :  { %v1327_v63 = vadd.f32 1.0, %v1326_v42  ;;  %v1589_v0 = vpop.eup %1588  ;;  %v1316_v22 = vadd.f32 1.1283791, %v1315_v43 }
0x1213   :  { %v1289_v49 = vmul.f32 %v1589_v0, %v1287_v60  ;;  %vm1294_vm13 = vweird.f32 %v1589_v0 }
0x1214   :  { %1590 = vrcp.f32 %v1327_v63  ;;  %vm1295_vm15 = vmor %vm1293_vm14, %vm1294_vm13  ;;  %v1339_v21 = vand.u32 2147483648, %v1327_v63  ;;  %v1337_v9 = vand.u32 2147483647, %v1327_v63  ;;  %vm1333_vm2 = vweird.f32 %v1327_v63 }
0x1215   :  { %v1290_v30 = vsub.f32 1.0, %v1289_v49  ;;  %v1317_v16 = vmul.f32 %v1316_v22, %v2048_v31 }
0x1216   :  { %v1340_v7 = vor.u32 1.1754944e-38, %v1339_v21  ;;  %vm1338_vm6 = vcmp.eq.f32.partialorder %v1337_v9, 8.507059e+37 }
0x1217   :  { %v1291_v5 = vmul.f32 %v1589_v0, %v1290_v30 }
0x1219   :  { %v1292_v10 = vadd.f32 %v1589_v0, %v1291_v5 }
0x121a   :  { %v1591_v8 = vpop.eup %1590 }
0x121b   :  { %v1329_v11 = vmul.f32 %v1591_v8, %v1327_v63  ;;  %v1296_v13 = vsel %vm1295_vm15, %v1589_v0, %v1292_v10  ;;  %vm1334_vm1 = vweird.f32 %v1591_v8 }
0x121c   :  { %v1301_v14 = vsel %vm1298_vm0, %v1300_v38, %v1296_v13  ;;  %vm1335_vm5 = vmor %vm1333_vm2, %vm1334_vm1 }
0x121d   :  { %v1330_v15 = vsub.f32 1.0, %v1329_v11  ;;  %v1302_v19 = vmul.f32 %v1301_v14, %v1277_v12 }
0x121f   :  { %v1331_v23 = vmul.f32 %v1591_v8, %v1330_v15  ;;  %v1493_v26 = vclamps-f32 %v1302_v19, 1.0 }
0x1221   :  { %v1332_v28 = vadd.f32 %v1591_v8, %v1331_v23  ;;  %v1345_v20 = vadd.f32 1.0, %v1493_v26 }
0x1223   :  { %v1336_v37 = vsel %vm1335_vm5, %v1591_v8, %v1332_v28  ;;  %v1347_v17 = vmul.f32 %v1345_v20, %v1261_v29 }
0x1224   :  { %v1341_v40 = vsel %vm1338_vm6, %v1340_v7, %v1336_v37 }
0x1225   :  { %v1342_v32 = vmul.f32 %v1341_v40, %v1317_v16  ;;  %1349 = vst.msk [vmem:[#allocation2] sm:$0xff] %vm193_vm3, %v1347_v17 }
0x1227   :  { %v1494_v41 = vclamps-f32 %v1342_v32, 1.0 }
0x1229   :  { %v1346_v44 = vadd.f32 1.0, %v1494_v41 }
0x122b   :  { %v1348_v31 = vmul.f32 %v1346_v44, %v1262_v62 }
0x122d   :  { %1350 = vst.msk [vmem:[#allocation2 + $0x8] sm:$0xff] %vm193_vm3, %v1348_v31 }
0x122e   :  { %1363 = dma.vmem_to_hbm [thread:$0]  %s1356_s16, 256, %s1358_s19, [#allocation3], %s1623_s2, %s1623_s2, %s1624_s8  }
0x122f   :  { %1616 = dma.done.wait [#allocation3], 256  }
0x1230   :  { %1617 = vsyncadd [#allocation3], 4294967040 }
0x1231   :  { %1368 = vsyncpa [#allocation3], 1 }

</bundles_post_ra>
